<compile_context>
chip_gen: v7x
topology: tpu7x:2x2x1
jax: 0.10.0
libtpu: 0.0.40
codegen_flags: <defaults>
</compile_context>

<pallas_src>
import functools

import jax
import jax.numpy as jnp
from jax.experimental import pallas as pl
from jax.experimental.pallas import tpu as pltpu

# ----------------------------- configuration --------------------------------
NUM_FREQS = 4                               # frequency-encoding frequencies
NUM_INPUT_DIMS = 3                          # 3-D positions
ENC_IN = NUM_INPUT_DIMS * 2 * NUM_FREQS     # 24
N_NEURONS = 32                              # config['n_neurons'] (both MLPs)
N_HIDDEN_LAYERS = 2                         # config['n_hidden_layers']
DEC_IN = 2 * N_NEURONS                      # AddDiff symmetrizer doubles width
DEC_OUT = 1


# ------------------------------- kernel --------------------------------------
def _feature_major_freq_encode(p):
    """p: (3, M) feature-major positions -> (24, M) frequency features.

    Only sin/cos of the base frequency hit the EUP; the 2^f harmonics are
    derived with double-angle identities (pure VPU work).
    """
    s = jnp.sin(jnp.float32(jnp.pi) * p)
    c = jnp.cos(jnp.float32(jnp.pi) * p)
    feats = [s, c]
    for _ in range(NUM_FREQS - 1):
        s, c = 2.0 * s * c, c * c - s * s        # sin/cos of doubled angle
        feats.append(s)
        feats.append(c)
    return jnp.concatenate(feats, axis=0)        # (24, M)


def correlation_srn_kernel(pos_ref, we0_ref, we1_ref, we2_ref,
                           wd0a_ref, wd0b_ref, wd1_ref, wd2c_ref,
                           out_ref, *, tile_b):
    def dot(w_ref, h):
        w = w_ref[...]
        # weights arrive pre-cast (f32 or bf16); cast activations to match at
        # the MXU boundary, accumulate in f32.
        return jnp.dot(w, h.astype(w.dtype), preferred_element_type=jnp.float32)

    # pos_ref holds [pos0_tile | pos1_tile] side by side on the lane axis.
    enc = _feature_major_freq_encode(pos_ref[...])        # (24, 2*tile_b)

    # Shared-weight encoder MLP (bias-free, ReLU on hidden layers only).
    h = jnp.maximum(dot(we0_ref, enc), 0.0)
    h = jnp.maximum(dot(we1_ref, h), 0.0)
    e = dot(we2_ref, h)                                   # (32, 2*tile_b)

    e0 = e[:, :tile_b]
    e1 = e[:, tile_b:]

    # SymmetrizerAddDiff with the feature concat folded into decoder layer 0:
    #   W0 @ concat([e0+e1, |e0-e1|]) == W0[:, :32] @ (e0+e1) + W0[:, 32:] @ |e0-e1|
    h = dot(wd0a_ref, e0 + e1) + dot(wd0b_ref, jnp.abs(e0 - e1))
    h = jnp.maximum(h, 0.0)
    h = jnp.maximum(dot(wd1_ref, h), 0.0)

    # Final 32 -> 1 layer (f32): broadcast-multiply + sublane reduction keeps the
    # output store lane-dense and avoids an N=1 / M=1 matmul.
    y = jnp.sum(wd2c_ref[...] * h, axis=0, keepdims=True)   # (1, tile_b)
    out_ref[...] = y.astype(out_ref.dtype)


# ------------------------------- wrapper --------------------------------------
@functools.partial(jax.jit, static_argnames=("tile_b", "use_bf16"))
def correlation_srn_forward(pos0, pos1, params, *, tile_b=512, use_bf16=True):
    """pos0, pos1: (B, 3) float32 -> (B, 1) float32 correlation scores."""
    B = pos0.shape[0]
    if tile_b > B:
        tile_b = B
    assert B % tile_b == 0, "batch must be a multiple of tile_b"
    assert tile_b % 128 == 0 or tile_b == B, "tile_b should be a multiple of 128"

    we0, we1, we2, wd0, wd1, wd2 = params          # PyTorch (out, in) layout

    mm_dtype = jnp.bfloat16 if use_bf16 else jnp.float32
    we0 = we0.astype(mm_dtype)
    we1 = we1.astype(mm_dtype)
    we2 = we2.astype(mm_dtype)
    wd0a = wd0[:, :N_NEURONS].astype(mm_dtype)     # acts on e0 + e1
    wd0b = wd0[:, N_NEURONS:].astype(mm_dtype)     # acts on |e0 - e1|
    wd1 = wd1.astype(mm_dtype)
    wd2c = wd2.reshape(N_NEURONS, 1).astype(jnp.float32)   # final layer stays f32

    # Feature-major, per-tile interleaved positions: each grid step DMAs one
    # (3, 2*tile_b) block holding [pos0_tile | pos1_tile].
    nb = B // tile_b
    p0 = pos0.T.reshape(NUM_INPUT_DIMS, nb, tile_b)
    p1 = pos1.T.reshape(NUM_INPUT_DIMS, nb, tile_b)
    pos01 = jnp.stack([p0, p1], axis=2).reshape(NUM_INPUT_DIMS, 2 * B)

    def w_spec(w):
        return pl.BlockSpec(w.shape, lambda i: (0, 0))

    grid_spec = pltpu.PrefetchScalarGridSpec(
        num_scalar_prefetch=0,
        grid=(nb,),
        in_specs=[
            pl.BlockSpec((NUM_INPUT_DIMS, 2 * tile_b), lambda i: (0, i)),
            w_spec(we0), w_spec(we1), w_spec(we2),
            w_spec(wd0a), w_spec(wd0b), w_spec(wd1), w_spec(wd2c),
        ],
        out_specs=pl.BlockSpec((1, tile_b), lambda i: (0, i)),
    )

    out = pl.pallas_call(
        functools.partial(correlation_srn_kernel, tile_b=tile_b),
        out_shape=jax.ShapeDtypeStruct((1, B), jnp.float32),
        grid_spec=grid_spec,
        compiler_params=pltpu.CompilerParams(
            dimension_semantics=("parallel",)),
    )(pos01, we0, we1, we2, wd0a, wd0b, wd1, wd2c)

    return out.reshape(B, DEC_OUT)


# --------------------------- parameter creation -------------------------------
def make_params(key):
    """Deterministic bias-free Linear weights in PyTorch (out, in) layout."""
    shapes_out_in = [
        (N_NEURONS, ENC_IN),      # encoder layer 0
        (N_NEURONS, N_NEURONS),   # encoder layer 1
        (N_NEURONS, N_NEURONS),   # encoder layer 2
        (N_NEURONS, DEC_IN),      # decoder layer 0
        (N_NEURONS, N_NEURONS),   # decoder layer 1
        (DEC_OUT, N_NEURONS),     # decoder layer 2
    ]
    params = []
    for shape in shapes_out_in:
        key, sub = jax.random.split(key)
        w = jax.random.normal(sub, shape, dtype=jnp.float32) * (
            1.0 / jnp.sqrt(jnp.float32(shape[1])))
        params.append(w)
    return tuple(params)


# ------------------------------ reference -------------------------------------
def correlation_srn_reference(pos0, pos1, params, use_bf16=True):
    """Plain-JAX reference (batch-major, direct sin/cos, explicit concat)."""
    we0, we1, we2, wd0, wd1, wd2 = params

    def dot(x, w, bf16):
        wt = w.T
        if bf16:
            x = x.astype(jnp.bfloat16)
            wt = wt.astype(jnp.bfloat16)
        return jnp.dot(x, wt, preferred_element_type=jnp.float32)

    def encode(x):
        feats = []
        for f in range(NUM_FREQS):
            s = x * (jnp.float32(2.0 ** f) * jnp.float32(jnp.pi))
            feats.append(jnp.sin(s))
            feats.append(jnp.cos(s))
        return jnp.concatenate(feats, axis=-1)

    def encoder(x):
        h = encode(x)
        h = jnp.maximum(dot(h, we0, use_bf16), 0.0)
        h = jnp.maximum(dot(h, we1, use_bf16), 0.0)
        return dot(h, we2, use_bf16)

    e0 = encoder(pos0)
    e1 = encoder(pos1)
    sym = jnp.concatenate([e0 + e1, jnp.abs(e0 - e1)], axis=-1)
    h = jnp.maximum(dot(sym, wd0, use_bf16), 0.0)
    h = jnp.maximum(dot(h, wd1, use_bf16), 0.0)
    return dot(h, wd2, False)        # final 32->1 layer kept in f32 (as kernel)


# --------------------------------- main ----------------------------------------
if __name__ == "__main__":
    key = jax.random.PRNGKey(0)
    kp, k0, k1 = jax.random.split(key, 3)

    B = 1024            # grid of 2 tiles at tile_b=512 (keeps both v7x TCs busy)
    pos0 = jax.random.uniform(k0, (B, NUM_INPUT_DIMS), dtype=jnp.float32)
    pos1 = jax.random.uniform(k1, (B, NUM_INPUT_DIMS), dtype=jnp.float32)
    params = make_params(kp)

    # f32 matmul path: tight check against the plain-JAX reference.
    out_f32 = jax.block_until_ready(
        correlation_srn_forward(pos0, pos1, params, tile_b=512, use_bf16=False))
    ref_f32 = correlation_srn_reference(pos0, pos1, params, use_bf16=False)
    assert out_f32.shape == (B, DEC_OUT)
    assert jnp.allclose(out_f32, ref_f32, atol=5e-4, rtol=5e-4)

    # bf16-at-the-MXU path (default, for v6e/v7x): bf16 quantization dominates
    # the tolerance here.
    out_bf16 = jax.block_until_ready(
        correlation_srn_forward(pos0, pos1, params, tile_b=512, use_bf16=True))
    ref_bf16 = correlation_srn_reference(pos0, pos1, params, use_bf16=True)
    assert out_bf16.shape == (B, DEC_OUT)
    assert jnp.allclose(out_bf16, ref_bf16, atol=1e-2, rtol=1e-2)

    print("KERNEL_OK")
</pallas_src>

<mosaic_0001>
module attributes {stable_mosaic.version = 11 : i64} {
  func.func @correlation_srn_kernel(%arg0: i32, %arg1: memref<3x1024xf32, #tpu.memory_space<vmem>>, %arg2: memref<32x24xf32, #tpu.memory_space<vmem>>, %arg3: memref<32x32xf32, #tpu.memory_space<vmem>>, %arg4: memref<32x32xf32, #tpu.memory_space<vmem>>, %arg5: memref<32x32xf32, #tpu.memory_space<vmem>>, %arg6: memref<32x32xf32, #tpu.memory_space<vmem>>, %arg7: memref<32x32xf32, #tpu.memory_space<vmem>>, %arg8: memref<32x1xf32, #tpu.memory_space<vmem>>, %arg9: memref<1x512xf32, #tpu.memory_space<vmem>>) attributes {dimension_semantics = [#tpu.dimension_semantics<parallel>], iteration_bounds = array<i64: 2>, scalar_prefetch = 0 : i64, scratch_operands = 0 : i64, tpu.core_type = #tpu.core_type<tc>, window_params = [{transform_indices = @transform_0, window_bounds = array<i64: 3, 1024>}, {pipeline_mode = #tpu.pipeline_mode<synchronous>, transform_indices = @transform_1, window_bounds = array<i64: 32, 24>}, {pipeline_mode = #tpu.pipeline_mode<synchronous>, transform_indices = @transform_2, window_bounds = array<i64: 32, 32>}, {pipeline_mode = #tpu.pipeline_mode<synchronous>, transform_indices = @transform_3, window_bounds = array<i64: 32, 32>}, {pipeline_mode = #tpu.pipeline_mode<synchronous>, transform_indices = @transform_4, window_bounds = array<i64: 32, 32>}, {pipeline_mode = #tpu.pipeline_mode<synchronous>, transform_indices = @transform_5, window_bounds = array<i64: 32, 32>}, {pipeline_mode = #tpu.pipeline_mode<synchronous>, transform_indices = @transform_6, window_bounds = array<i64: 32, 32>}, {pipeline_mode = #tpu.pipeline_mode<synchronous>, transform_indices = @transform_7, window_bounds = array<i64: 32, 1>}, {transform_indices = @transform_8, window_bounds = array<i64: 1, 512>}]} {
    %c0 = arith.constant 0 : index
    %c0_0 = arith.constant 0 : index
    %0 = vector.load %arg1[%c0, %c0_0] : memref<3x1024xf32, #tpu.memory_space<vmem>>, vector<3x1024xf32>
    %cst = arith.constant 3.14159274 : f32
    %1 = vector.broadcast %cst : f32 to vector<3x1024xf32>
    %2 = arith.mulf %1, %0 : vector<3x1024xf32>
    %3 = math.sin %2 : vector<3x1024xf32>
    %cst_1 = arith.constant 3.14159274 : f32
    %4 = vector.broadcast %cst_1 : f32 to vector<3x1024xf32>
    %5 = arith.mulf %4, %0 : vector<3x1024xf32>
    %6 = math.cos %5 : vector<3x1024xf32>
    %cst_2 = arith.constant 2.000000e+00 : f32
    %7 = vector.broadcast %cst_2 : f32 to vector<3x1024xf32>
    %8 = arith.mulf %7, %3 : vector<3x1024xf32>
    %9 = arith.mulf %8, %6 : vector<3x1024xf32>
    %10 = arith.mulf %6, %6 : vector<3x1024xf32>
    %11 = arith.mulf %3, %3 : vector<3x1024xf32>
    %12 = arith.subf %10, %11 : vector<3x1024xf32>
    %cst_3 = arith.constant 2.000000e+00 : f32
    %13 = vector.broadcast %cst_3 : f32 to vector<3x1024xf32>
    %14 = arith.mulf %13, %9 : vector<3x1024xf32>
    %15 = arith.mulf %14, %12 : vector<3x1024xf32>
    %16 = arith.mulf %12, %12 : vector<3x1024xf32>
    %17 = arith.mulf %9, %9 : vector<3x1024xf32>
    %18 = arith.subf %16, %17 : vector<3x1024xf32>
    %cst_4 = arith.constant 2.000000e+00 : f32
    %19 = vector.broadcast %cst_4 : f32 to vector<3x1024xf32>
    %20 = arith.mulf %19, %15 : vector<3x1024xf32>
    %21 = arith.mulf %20, %18 : vector<3x1024xf32>
    %22 = arith.mulf %18, %18 : vector<3x1024xf32>
    %23 = arith.mulf %15, %15 : vector<3x1024xf32>
    %24 = arith.subf %22, %23 : vector<3x1024xf32>
    %25 = tpu.concatenate %3, %6, %9, %12, %15, %18, %21, %24 in 0 : vector<3x1024xf32>, vector<3x1024xf32>, vector<3x1024xf32>, vector<3x1024xf32>, vector<3x1024xf32>, vector<3x1024xf32>, vector<3x1024xf32>, vector<3x1024xf32> -> vector<24x1024xf32>
    %c0_5 = arith.constant 0 : index
    %c0_6 = arith.constant 0 : index
    %26 = vector.load %arg2[%c0_5, %c0_6] : memref<32x24xf32, #tpu.memory_space<vmem>>, vector<32x24xf32>
    %cst_7 = arith.constant dense<0.000000e+00> : vector<32x1024xf32>
    %27 = tpu.matmul %26, %25, %cst_7 {dimension_numbers = #tpu.dot_dimension_numbers<[1], [0], [0], [1], [0, 0, 1, 1], [], []>} : vector<32x24xf32>, vector<24x1024xf32>, vector<32x1024xf32> -> vector<32x1024xf32>
    %cst_8 = arith.constant 0.000000e+00 : f32
    %28 = vector.broadcast %cst_8 : f32 to vector<32x1024xf32>
    %29 = arith.maximumf %27, %28 : vector<32x1024xf32>
    %c0_9 = arith.constant 0 : index
    %c0_10 = arith.constant 0 : index
    %30 = vector.load %arg3[%c0_9, %c0_10] : memref<32x32xf32, #tpu.memory_space<vmem>>, vector<32x32xf32>
    %cst_11 = arith.constant dense<0.000000e+00> : vector<32x1024xf32>
    %31 = tpu.matmul %30, %29, %cst_11 {dimension_numbers = #tpu.dot_dimension_numbers<[1], [0], [0], [1], [0, 0, 1, 1], [], []>} : vector<32x32xf32>, vector<32x1024xf32>, vector<32x1024xf32> -> vector<32x1024xf32>
    %cst_12 = arith.constant 0.000000e+00 : f32
    %32 = vector.broadcast %cst_12 : f32 to vector<32x1024xf32>
    %33 = arith.maximumf %31, %32 : vector<32x1024xf32>
    %c0_13 = arith.constant 0 : index
    %c0_14 = arith.constant 0 : index
    %34 = vector.load %arg4[%c0_13, %c0_14] : memref<32x32xf32, #tpu.memory_space<vmem>>, vector<32x32xf32>
    %cst_15 = arith.constant dense<0.000000e+00> : vector<32x1024xf32>
    %35 = tpu.matmul %34, %33, %cst_15 {dimension_numbers = #tpu.dot_dimension_numbers<[1], [0], [0], [1], [0, 0, 1, 1], [], []>} : vector<32x32xf32>, vector<32x1024xf32>, vector<32x1024xf32> -> vector<32x1024xf32>
    %36 = vector.extract_strided_slice %35 {offsets = [0, 0], sizes = [32, 512], strides = [1, 1]} : vector<32x1024xf32> to vector<32x512xf32>
    %37 = vector.extract_strided_slice %35 {offsets = [0, 512], sizes = [32, 512], strides = [1, 1]} : vector<32x1024xf32> to vector<32x512xf32>
    %38 = arith.addf %36, %37 : vector<32x512xf32>
    %c0_16 = arith.constant 0 : index
    %c0_17 = arith.constant 0 : index
    %39 = vector.load %arg5[%c0_16, %c0_17] : memref<32x32xf32, #tpu.memory_space<vmem>>, vector<32x32xf32>
    %cst_18 = arith.constant dense<0.000000e+00> : vector<32x512xf32>
    %40 = tpu.matmul %39, %38, %cst_18 {dimension_numbers = #tpu.dot_dimension_numbers<[1], [0], [0], [1], [0, 0, 1, 1], [], []>} : vector<32x32xf32>, vector<32x512xf32>, vector<32x512xf32> -> vector<32x512xf32>
    %41 = arith.subf %36, %37 : vector<32x512xf32>
    %42 = math.absf %41 : vector<32x512xf32>
    %c0_19 = arith.constant 0 : index
    %c0_20 = arith.constant 0 : index
    %43 = vector.load %arg6[%c0_19, %c0_20] : memref<32x32xf32, #tpu.memory_space<vmem>>, vector<32x32xf32>
    %cst_21 = arith.constant dense<0.000000e+00> : vector<32x512xf32>
    %44 = tpu.matmul %43, %42, %cst_21 {dimension_numbers = #tpu.dot_dimension_numbers<[1], [0], [0], [1], [0, 0, 1, 1], [], []>} : vector<32x32xf32>, vector<32x512xf32>, vector<32x512xf32> -> vector<32x512xf32>
    %45 = arith.addf %40, %44 : vector<32x512xf32>
    %cst_22 = arith.constant 0.000000e+00 : f32
    %46 = vector.broadcast %cst_22 : f32 to vector<32x512xf32>
    %47 = arith.maximumf %45, %46 : vector<32x512xf32>
    %c0_23 = arith.constant 0 : index
    %c0_24 = arith.constant 0 : index
    %48 = vector.load %arg7[%c0_23, %c0_24] : memref<32x32xf32, #tpu.memory_space<vmem>>, vector<32x32xf32>
    %cst_25 = arith.constant dense<0.000000e+00> : vector<32x512xf32>
    %49 = tpu.matmul %48, %47, %cst_25 {dimension_numbers = #tpu.dot_dimension_numbers<[1], [0], [0], [1], [0, 0, 1, 1], [], []>} : vector<32x32xf32>, vector<32x512xf32>, vector<32x512xf32> -> vector<32x512xf32>
    %cst_26 = arith.constant 0.000000e+00 : f32
    %50 = vector.broadcast %cst_26 : f32 to vector<32x512xf32>
    %51 = arith.maximumf %49, %50 : vector<32x512xf32>
    %c0_27 = arith.constant 0 : index
    %c0_28 = arith.constant 0 : index
    %52 = vector.load %arg8[%c0_27, %c0_28] : memref<32x1xf32, #tpu.memory_space<vmem>>, vector<32x1xf32>
    %53 = vector.broadcast %52 : vector<32x1xf32> to vector<32x512xf32>
    %54 = arith.mulf %53, %51 : vector<32x512xf32>
    %cst_29 = arith.constant dense<0.000000e+00> : vector<512xf32>
    %55 = vector.multi_reduction <add>, %54, %cst_29 [0] : vector<32x512xf32> to vector<512xf32>
    %56 = vector.shape_cast %55 : vector<512xf32> to vector<1x512xf32>
    %c0_30 = arith.constant 0 : index
    %c0_31 = arith.constant 0 : index
    %57 = vector.load %arg9[%c0_30, %c0_31] : memref<1x512xf32, #tpu.memory_space<vmem>>, vector<1x512xf32>
    tpu.vector_store %arg9[%c0_30, %c0_31], %56 {strides = array<i32>} : memref<1x512xf32, #tpu.memory_space<vmem>>, vector<1x512xf32>,
    return
  }
  func.func @transform_0(%arg0: i32) -> (i32, i32) {
    %c0_i32 = arith.constant 0 : i32
    %c0_i32_0 = arith.constant 0 : i32
    return %c0_i32, %arg0 : i32, i32
  }
  func.func @transform_1(%arg0: i32) -> (i32, i32) {
    %c0_i32 = arith.constant 0 : i32
    %c0_i32_0 = arith.constant 0 : i32
    %c0_i32_1 = arith.constant 0 : i32
    return %c0_i32, %c0_i32_0 : i32, i32
  }
  func.func @transform_2(%arg0: i32) -> (i32, i32) {
    %c0_i32 = arith.constant 0 : i32
    %c0_i32_0 = arith.constant 0 : i32
    %c0_i32_1 = arith.constant 0 : i32
    return %c0_i32, %c0_i32_0 : i32, i32
  }
  func.func @transform_3(%arg0: i32) -> (i32, i32) {
    %c0_i32 = arith.constant 0 : i32
    %c0_i32_0 = arith.constant 0 : i32
    %c0_i32_1 = arith.constant 0 : i32
    return %c0_i32, %c0_i32_0 : i32, i32
  }
  func.func @transform_4(%arg0: i32) -> (i32, i32) {
    %c0_i32 = arith.constant 0 : i32
    %c0_i32_0 = arith.constant 0 : i32
    %c0_i32_1 = arith.constant 0 : i32
    return %c0_i32, %c0_i32_0 : i32, i32
  }
  func.func @transform_5(%arg0: i32) -> (i32, i32) {
    %c0_i32 = arith.constant 0 : i32
    %c0_i32_0 = arith.constant 0 : i32
    %c0_i32_1 = arith.constant 0 : i32
    return %c0_i32, %c0_i32_0 : i32, i32
  }
  func.func @transform_6(%arg0: i32) -> (i32, i32) {
    %c0_i32 = arith.constant 0 : i32
    %c0_i32_0 = arith.constant 0 : i32
    %c0_i32_1 = arith.constant 0 : i32
    return %c0_i32, %c0_i32_0 : i32, i32
  }
  func.func @transform_7(%arg0: i32) -> (i32, i32) {
    %c0_i32 = arith.constant 0 : i32
    %c0_i32_0 = arith.constant 0 : i32
    %c0_i32_1 = arith.constant 0 : i32
    return %c0_i32, %c0_i32_0 : i32, i32
  }
  func.func @transform_8(%arg0: i32) -> (i32, i32) {
    %c0_i32 = arith.constant 0 : i32
    %c0_i32_0 = arith.constant 0 : i32
    return %c0_i32, %arg0 : i32, i32
  }
}

</mosaic_0001>

<bundles_post_ra>
// kernel: correlation_srn_forward.1
= control target key start
LH: loop header
LB: loop body
LE: loop exit
PB: predicated region body
PF: predicated region fallthrough
CT: control target
= control target key end

     0   :  { %13 = vsyncpa [#allocation3], 0  ;;  %s4830_s0 = inlined_call_operand.vmem [shape: f32[3,2048], index: 0, kind: input, shape index: {}]   ;;  %s4831_s1 = inlined_call_operand.vmem [shape: f32[32,24], index: 1, kind: input, shape index: {}]   ;;  %s4832_s2 = inlined_call_operand.vmem [shape: f32[32,32], index: 2, kind: input, shape index: {}]   ;;  %s4833_s3 = inlined_call_operand.vmem [shape: f32[32,32], index: 3, kind: input, shape index: {}]   ;;  %s4834_s4 = inlined_call_operand.vmem [shape: f32[32,32], index: 4, kind: input, shape index: {}]   ;;  %s4835_s5 = inlined_call_operand.vmem [shape: f32[32,32], index: 5, kind: input, shape index: {}]   ;;  %s4836_s6 = inlined_call_operand.vmem [shape: f32[32,32], index: 6, kind: input, shape index: {}]   ;;  %s4837_s7 = inlined_call_operand.vmem [shape: f32[32,1], index: 7, kind: input, shape index: {}]   ;;  %s4838_s8 = inlined_call_operand.hbm [shape: f32[1,1024], index: 8, kind: output, shape index: {}]  }
   0x1   :  { %15 = vsyncpa [#allocation3 + $0x1], 0  ;;  %s3924_s27 = smov 0   ;;  %s3926_s28 = smov 0  }
   0x2   :  { %s3928_s29 = smov 0   ;;  %s3930_s30 = smov 0  }
   0x3 LB: > { %s3945_s9 = sadd.s32 4294967295, %s3867_s30   ;;  %s3462_s10 = sadd.s32 4294967294, %s3867_s30   ;;  %s3867_s30 = sphi %s3930_s30, %s4850_s30   ;;  %s3863_s29 = sphi %s3928_s29, %s4849_s29   ;;  %s3859_s28 = sphi %s3926_s28, %s4848_s28   ;;  %s3855_s27 = sphi %s3924_s27, %s4847_s27  }
   0x4   : > { %s3949_s11 = sadd.s32 1, %s3867_s30   ;;  %s201_s12 = sadd.s32 1, %s3863_s29 }
   0x5   : > { %s198_s13 = ssub.s32 %s3867_s30, %s3949_s11  ;;  %p211_p0 = scmp.ne.s32.totalorder %s3863_s29, %s3859_s28 }
   0x6   : > { %p199_p1 = scmp.eq.s32.totalorder %s198_s13, 0  ;;  %p212_p2 = scmp.eq.s32.totalorder %s3945_s9, 1 }
   0x7   : > { %p217_p3 = scmp.ne.s32.totalorder %s3859_s28, %s3855_s27  ;;  %p218_p4 = scmp.eq.s32.totalorder %s3462_s10, 1 }
   0x8   : > { %s3960_s14 = scalar_select %p199_p1, %s3863_s29, %s201_s12  }
   0x9   : > { %p3962_p5 = por %p212_p2, %p211_p0  ;;  %p3966_p6 = por %p218_p4, %p217_p3 }
   0xa   : > { %p3465_p7 = scmp.ge.s32.totalorder %s3867_s30, 1  ;;  %p266_p8 = scmp.lt.s32.totalorder %s3867_s30, 3 }
   0xc   : > { %p267_p9 = pnand %p3465_p7, %p266_p8 }
   0xd   : > { %s3467_s17 = sshll.u32 (!%p267_p9), %s3945_s9, 3  ;;  %v3869_v0 = vmov (!%p267_p9), 0.0   ;;  %v3870_v36 = vmov (!%p267_p9), 683565275   ;;  %v3871_v38 = vmov (!%p267_p9), 2475754826  }
   0xe   : > { %270 = sbr.rel (%p267_p9) target bundleno = 1437 (0x59d), region = 52  ;;  %p301_p10 = scmp.lt.s32.totalorder (!%p267_p9), %s3467_s17, 15  ;;  %1515 = vmatprep.mubr.f32.mxu0 (!%p267_p9), %v3869_v0  ;;  %1604 = vmatprep.mubr.f32.mxu1 (!%p267_p9), %v3869_v0  ;;  %v3872_v40 = vmov (!%p267_p9), 2131351028   ;;  %v3873_v42 = vmov (!%p267_p9), 2102212464  }
   0xf   : > { %v3874_v44 = vmov (!%p267_p9), 920167782   ;;  %v3875_v52 = vmov (!%p267_p9), 1326507024   ;;  %s297_s26 = sand.u32 (!%p267_p9), 1, %s3859_s28   ;;  %s3578_s12 = sshll.u32 (!%p267_p9), %s3945_s9, 6 }
  0x10   : > { %s3466_s10 = sshll.u32 (!%p267_p9), %s297_s26, 2  ;;  %s4788_s20 = scalar_lea.hbm (!%p267_p9), %s4838_s8, %s3578_s12 }
  0x11   : > { %s299_s13 = scalar_lea.vmem (!%p267_p9), [#allocation2], %s3466_s10  ;;  %s3878_s9 = smov (!%p267_p9), [#allocation2]  }
  0x12   : > { %s3809_s23 = sshll.u32 (!%p267_p9), %s3878_s9, 4  ;;  %s3810_s23 = int_to_ptr.vmem [resolvable:$false] %s3809_s23 }
  0x13   : > { %s3811_s24 = scalar_lea.vmem (!%p267_p9), %s3810_s23, 128 }
  0x15   : > { %s4852_s17 = smov (!%p301_p10, %s3467_s17), 15 }
  0x16   : > { %s3468_s18 = sshll.u32 %s4852_s17, 2  ;;  %s3403_s17 = sshll.u32 %s299_s13, 4  ;;  %s4790_s17 = int_to_ptr.vmem [resolvable:$true] %s3403_s17 }
  0x17   : > { %s304_s21 = scalar_lea.vmem %s4830_s0, %s3468_s18  ;;  %s3805_s22 = scalar_lea.vmem %s4790_s17, 64 }
  0x18   : > { %v307_v1 = vld [vmem:[%s304_s21] sm:$0x77]  ;;  %v308_v2 = vld [vmem:[%s304_s21 + $0x8] sm:$0x77]  ;;  %v309_v3 = vld [vmem:[%s304_s21 + $0x10] sm:$0x77]  ;;  %p3806_p11 = scmp.ne.s32.totalorder %s4790_s17, %s3805_s22  ;;  %p3812_p0 = scmp.lt.s32.totalorder %s4790_s17, %s3810_s23 }
  0x19   : > { %v3978_v4 = vmul.f32 3.1415927, %v307_v1  ;;  %v3980_v5 = vmul.f32 3.1415927, %v308_v2  ;;  %v3982_v6 = vmul.f32 3.1415927, %v309_v3  ;;  %p3813_p1 = scmp.lt.s32.totalorder %s3811_s24, %s3805_s22 }
  0x1a   : > { %v310_v24 = vld [vmem:[%s304_s21 + $0x18] sm:$0x77]  ;;  %s3389_s21 = scalar_lea.sflag [#allocation3], %s297_s26  ;;  %p3807_p12 = pnand %p3806_p11, %p3962_p5 }
  0x1b   : > { %v315_v7 = vand.u32 2147483647, %v3978_v4  ;;  %v318_v8 = vand.u32 2139095040, %v3978_v4  ;;  %v419_v9 = vand.u32 2147483647, %v3980_v5  ;;  %v422_v10 = vand.u32 2139095040, %v3980_v5  ;;  %p3814_p2 = por %p3813_p1, %p3812_p0 }
  0x1c   : > { %v526_v15 = vand.u32 2139095040, %v3982_v6  ;;  %v523_v26 = vand.u32 2147483647, %v3982_v6  ;;  %v3994_v30 = vmul.f32 3.1415927, %v310_v24  ;;  %vm317_vm13 = vcmp.lt.s32.totalorder %v3978_v4, 0  ;;  %p3808_p13 = pneg %p3807_p12 }
  0x1d   : > { %v319_v11 = vshrl.u32 %v318_v8, 23  ;;  %v322_v12 = vand.u32 8388607, %v315_v7  ;;  %v423_v13 = vshrl.u32 %v422_v10, 23  ;;  %v426_v14 = vand.u32 8388607, %v419_v9 }
  0x1e   : > { %v527_v18 = vshrl.u32 %v526_v15, 23  ;;  %vm4092_vm14 = vcmp.le.f32.partialorder %v315_v7, 0.7853982  ;;  %p3815_p3 = pnand %p3814_p2, %p3808_p13 }
  0x1f   : > { %v3469_v16 = vadd.s32 4294967169, %v319_v11  ;;  %v3473_v17 = vadd.s32 4294967169, %v423_v13  ;;  %v323_v20 = vor.u32 8388608, %v322_v12  ;;  %v427_v21 = vor.u32 8388608, %v426_v14 }
  0x20   : > { %v3477_v23 = vadd.s32 4294967169, %v527_v18 }
  0x21   : > { %v325_v19 = vadd.s32 1, %v3469_v16  ;;  %v429_v22 = vadd.s32 1, %v3473_v17  ;;  %v3996_v31 = vshll.u32 %v323_v20, 8  ;;  %v3998_v33 = vshll.u32 %v427_v21, 8 }
  0x22   : > { %v4000_v34 = vadd.s32 1, %v3477_v23 }
  0x23   : > { %vm326_vm0 = vcmp.gt.s32.totalorder %v325_v19, 0  ;;  %vm430_vm1 = vcmp.gt.s32.totalorder %v429_v22, 0 }
  0x24   : > { %v327_v25 = vsel %vm326_vm0, %v325_v19, 0  ;;  %v431_v29 = vsel %vm430_vm1, %v429_v22, 0  ;;  %vm534_vm6 = vcmp.gt.s32.totalorder %v4000_v34, 0  ;;  %vm421_vm0 = vcmp.lt.s32.totalorder %v3980_v5, 0 }
  0x25   : > { %v328_v27 = vshrl.u32 %v327_v25, 5  ;;  %v329_v28 = vand.u32 31, %v327_v25  ;;  %v433_v32 = vand.u32 31, %v431_v29  ;;  %v4007_v46 = vshrl.u32 %v431_v29, 5 }
  0x27   : > { %v330_v35 = vsub.s32 32, %v329_v28  ;;  %v332_v37 = vshll.u32 %v3870_v36, %v329_v28  ;;  %v335_v39 = vshll.u32 %v3871_v38, %v329_v28  ;;  %v338_v41 = vshll.u32 %v3872_v40, %v329_v28 }
  0x28   : > { %v341_v43 = vshll.u32 %v3873_v42, %v329_v28  ;;  %v344_v45 = vshll.u32 %v3874_v44, %v329_v28  ;;  %vm347_vm2 = vcmp.lt.s32.totalorder %v328_v27, 1  ;;  %vm348_vm3 = vcmp.lt.s32.totalorder %v328_v27, 2 }
  0x29   : > { %v331_v47 = vshrl.u32 %v3870_v36, %v330_v35  ;;  %v333_v48 = vshrl.u32 %v3871_v38, %v330_v35  ;;  %v336_v49 = vshrl.u32 %v3872_v40, %v330_v35  ;;  %v339_v50 = vshrl.u32 %v3873_v42, %v330_v35 }
  0x2a   : > { %v342_v51 = vshrl.u32 %v3874_v44, %v330_v35  ;;  %v345_v53 = vshrl.u32 %v3875_v52, %v330_v35  ;;  %vm350_vm4 = vcmp.lt.s32.totalorder %v328_v27, 4  ;;  %v434_v57 = vsub.s32 32, %v433_v32 }
  0x2b   : > { %v334_v54 = vor.u32 %v333_v48, %v332_v37  ;;  %v337_v55 = vor.u32 %v336_v49, %v335_v39  ;;  %v340_v56 = vor.u32 %v339_v50, %v338_v41  ;;  %vm349_vm5 = vcmp.lt.s32.totalorder %v328_v27, 3 }
  0x2c   : > { %v343_v58 = vor.u32 %v342_v51, %v341_v43  ;;  %v346_v59 = vor.u32 %v345_v53, %v344_v45  ;;  %v436_v60 = vshll.u32 %v3870_v36, %v433_v32  ;;  %v439_v10 = vshll.u32 %v3871_v38, %v433_v32 }
  0x2d   : > { %v351_v61 = vsel %vm347_vm2, %v331_v47, %v334_v54  ;;  %v352_v62 = vsel %vm350_vm4, %v340_v56, 2102212464  ;;  %v355_v63 = vsel %vm347_vm2, %v334_v54, %v337_v55  ;;  %v359_v1 = vsel %vm347_vm2, %v337_v55, %v340_v56 }
  0x2e   : > { %v353_v2 = vsel %vm349_vm5, %v337_v55, %v352_v62  ;;  %v356_v3 = vsel %vm350_vm4, %v343_v58, 920167782  ;;  %v360_v8 = vsel %vm350_vm4, %v346_v59, 1326507024  ;;  %v435_v13 = vshrl.u32 %v3870_v36, %v434_v57 }
  0x2f   : > { %v357_v11 = vsel %vm349_vm5, %v340_v56, %v356_v3  ;;  %v361_v12 = vsel %vm349_vm5, %v343_v58, %v360_v8  ;;  %v437_v14 = vshrl.u32 %v3871_v38, %v434_v57  ;;  %v354_v15 = vsel %vm348_vm3, %v351_v61, %v353_v2 }
  0x30   : > { %v358_v16 = vsel %vm348_vm3, %v355_v63, %v357_v11  ;;  %v362_v17 = vsel %vm348_vm3, %v359_v1, %v361_v12  ;;  %v440_v18 = vshrl.u32 %v3872_v40, %v434_v57  ;;  %v442_v25 = vshll.u32 %v3872_v40, %v433_v32 }
  0x31   : > { %v4028_v19 = vmul.u32.u64.low %v3996_v31, %v362_v17  ;;  %v4029_v20 = vmul.u32.u64.high %v3996_v31, %v362_v17, %v4028_v19  ;;  %v4032_v21 = vmul.u32.u64.low %v3996_v31, %v358_v16  ;;  %v4033_v22 = vmul.u32.u64.high %v3996_v31, %v358_v16, %v4032_v21 }
  0x32   : > { %v438_v23 = vor.u32 %v437_v14, %v436_v60  ;;  %v441_v24 = vor.u32 %v440_v18, %v439_v10  ;;  %v443_v28 = vshrl.u32 %v3873_v42, %v434_v57  ;;  %v445_v29 = vshll.u32 %v3873_v42, %v433_v32 }
  0x33   : > { %v446_v27 = vshrl.u32 %v3874_v44, %v434_v57  ;;  %v448_v35 = vshll.u32 %v3874_v44, %v433_v32  ;;  %v449_v37 = vshrl.u32 %v3875_v52, %v434_v57  ;;  %v370_v39 = vmul.u32 %v3996_v31, %v354_v15 }
  0x34   : > { %v444_v41 = vor.u32 %v443_v28, %v442_v25  ;;  %vm451_vm7 = vcmp.lt.s32.totalorder %v4007_v46, 1  ;;  %vm452_vm8 = vcmp.lt.s32.totalorder %v4007_v46, 2  ;;  %vm372_vm9 = vc.u32 %v4029_v20, %v4032_v21 }
  0x35   : > { %v373_v43 = vadd.s32 1, %v4033_v22  ;;  %v447_v45 = vor.u32 %v446_v27, %v445_v29  ;;  %vm453_vm10 = vcmp.lt.s32.totalorder %v4007_v46, 3  ;;  %v450_v47 = vor.u32 %v449_v37, %v448_v35 }
  0x36   : > { %vm454_vm11 = vcmp.lt.s32.totalorder %v4007_v46, 4  ;;  %v455_v32 = vsel %vm451_vm7, %v435_v13, %v438_v23  ;;  %v459_v48 = vsel %vm451_vm7, %v438_v23, %v441_v24  ;;  %v463_v51 = vsel %vm451_vm7, %v441_v24, %v444_v41 }
  0x37   : > { %v374_v49 = vsel %vm372_vm9, %v373_v43, %v4033_v22  ;;  %v456_v31 = vsel %vm454_vm11, %v444_v41, 2102212464  ;;  %v460_v50 = vsel %vm454_vm11, %v447_v45, 920167782  ;;  %v464_v56 = vsel %vm454_vm11, %v450_v47, 1326507024 }
  0x38   : > { %v375_v53 = vadd.s32 %v374_v49, %v370_v39  ;;  %v457_v54 = vsel %vm453_vm10, %v441_v24, %v456_v31  ;;  %v461_v55 = vsel %vm453_vm10, %v444_v41, %v460_v50  ;;  %v465_v59 = vsel %vm453_vm10, %v447_v45, %v464_v56 }
  0x39   : > { %v458_v57 = vsel %vm452_vm8, %v455_v32, %v457_v54  ;;  %v462_v58 = vsel %vm452_vm8, %v459_v48, %v461_v55  ;;  %v535_v60 = vsel %vm534_vm6, %v4000_v34, 0  ;;  %v466_v62 = vsel %vm452_vm8, %v463_v51, %v465_v59 }
  0x3a   : > { %v376_v61 = vadd.s32 536870912, %v375_v53  ;;  %v4059_v63 = vmul.u32.u64.low %v3998_v33, %v462_v58  ;;  %v4060_v1 = vmul.u32.u64.high %v3998_v33, %v462_v58, %v4059_v63  ;;  %v530_v8 = vand.u32 8388607, %v523_v26 }
  0x3b   : > { %v4063_v2 = vmul.u32.u64.low %v3998_v33, %v466_v62  ;;  %v4064_v3 = vmul.u32.u64.high %v3998_v33, %v466_v62, %v4063_v2  ;;  %v630_v11 = vand.u32 2139095040, %v3994_v30  ;;  %v474_v34 = vmul.u32 %v3998_v33, %v458_v57 }
  0x3c   : > { %v377_v10 = vshrl.u32 %v376_v61, 30  ;;  %v537_v12 = vand.u32 31, %v535_v60  ;;  %v477_v46 = vadd.s32 1, %v4060_v1  ;;  %v531_v14 = vor.u32 8388608, %v530_v8 }
  0x3d   : > { %vm476_vm12 = vc.u32 %v4064_v3, %v4059_v63  ;;  %v631_v17 = vshrl.u32 %v630_v11, 23  ;;  %v4077_v33 = vshrl.u32 %v535_v60, 5  ;;  %v627_v25 = vand.u32 2147483647, %v3994_v30 }
  0x3e   : > { %v378_v13 = vshll.u32 %v377_v10, 30  ;;  %v478_v16 = vsel %vm476_vm12, %v477_v46, %v4060_v1  ;;  %v538_v19 = vsub.s32 32, %v537_v12  ;;  %v4079_v24 = vshll.u32 %v531_v14, 8 }
  0x3f   : > { %v479_v18 = vadd.s32 %v478_v16, %v474_v34  ;;  %v371_v28 = vadd.s32 %v4032_v21, %v4029_v20  ;;  %v540_v27 = vshll.u32 %v3870_v36, %v537_v12  ;;  %v4085_v35 = vadd.s32 4294967169, %v631_v17 }
  0x40   : > { %v4072_v15 = vsub.s32 %v375_v53, %v378_v13  ;;  %v541_v39 = vshrl.u32 %v3871_v38, %v538_v19  ;;  %v543_v41 = vshll.u32 %v3871_v38, %v537_v12  ;;  %v544_v43 = vshrl.u32 %v3872_v40, %v538_v19 }
  0x41   : > { %v480_v23 = vadd.s32 536870912, %v479_v18  ;;  %v546_v21 = vshll.u32 %v3872_v40, %v537_v12  ;;  %v547_v47 = vshrl.u32 %v3873_v42, %v538_v19  ;;  %v549_v32 = vshll.u32 %v3873_v42, %v537_v12 }
  0x42   : > { %v381_v22 = vsub.s32 0, %v4072_v15  ;;  %v401_v48 = vsub.s32 4, %v377_v10  ;;  %v550_v31 = vshrl.u32 %v3874_v44, %v538_v19  ;;  %vm555_vm15 = vcmp.lt.s32.totalorder %v4077_v33, 1 }
  0x43   : > { %v481_v37 = vshrl.u32 %v480_v23, 30  ;;  %vm556_vm1 = vcmp.lt.s32.totalorder %v4077_v33, 2  ;;  %vm557_vm2 = vcmp.lt.s32.totalorder %v4077_v33, 3  ;;  %vm558_vm3 = vcmp.lt.s32.totalorder %v4077_v33, 4 }
  0x44   : > { %v3470_v29 = vmin.u32 %v381_v22, %v4072_v15  ;;  %v542_v51 = vor.u32 %v541_v39, %v540_v27  ;;  %v552_v53 = vshll.u32 %v3874_v44, %v537_v12  ;;  %v553_v54 = vshrl.u32 %v3875_v52, %v538_v19 }
  0x45   : > { %v482_v49 = vshll.u32 %v481_v37, 30  ;;  %v545_v55 = vor.u32 %v544_v43, %v543_v41  ;;  %v548_v56 = vor.u32 %v547_v47, %v546_v21  ;;  %v551_v57 = vor.u32 %v550_v31, %v549_v32 }
  0x46   : > { %v383_v20 = vclz %v3470_v29  ;;  %v402_v59 = vsel %vm317_vm13, %v401_v48, %v377_v10  ;;  %v539_v61 = vshrl.u32 %v3870_v36, %v538_v19  ;;  %v475_v11 = vadd.s32 %v4059_v63, %v4064_v3 }
  0x47   : > { %v4105_v7 = vsub.s32 %v479_v18, %v482_v49  ;;  %v560_v8 = vsel %vm558_vm3, %v548_v56, 2102212464  ;;  %v505_v12 = vsub.s32 4, %v481_v37  ;;  %v554_v13 = vor.u32 %v553_v54, %v552_v53 }
  0x48   : > { %v3471_v50 = vadd.s32 4294967294, %v383_v20  ;;  %v563_v10 = vsel %vm555_vm15, %v542_v51, %v545_v55  ;;  %v564_v16 = vsel %vm558_vm3, %v551_v57, 920167782  ;;  %vm4126_vm5 = vcmp.le.f32.partialorder %v419_v9, 0.7853982 }
  0x49   : > { %v485_v60 = vsub.s32 0, %v4105_v7  ;;  %v559_v3 = vsel %vm555_vm15, %v539_v61, %v542_v51  ;;  %v561_v18 = vsel %vm557_vm2, %v545_v55, %v560_v8  ;;  %v565_v23 = vsel %vm557_vm2, %v548_v56, %v564_v16 }
  0x4a   : > { %vm3472_vm4 = vcmp.lt.s32.totalorder %v3471_v50, 0  ;;  %v506_v9 = vsel %vm421_vm0, %v505_v12, %v481_v37  ;;  %v566_v27 = vsel %vm556_vm1, %v563_v10, %v565_v23  ;;  %v568_v39 = vsel %vm558_vm3, %v554_v13, 1326507024 }
  0x4b   : > { %v386_v58 = vsel %vm3472_vm4, 0, %v3471_v50  ;;  %v3474_v34 = vmin.u32 %v485_v60, %v4105_v7  ;;  %v562_v20 = vsel %vm556_vm1, %v559_v3, %v561_v18  ;;  %v569_v21 = vsel %vm557_vm2, %v551_v57, %v568_v39 }
  0x4c   : > { %v387_v62 = vsub.s32 32, %v386_v58  ;;  %v388_v1 = vshll.u32 %v4072_v15, %v386_v58  ;;  %v391_v2 = vsub.s32 4294967266, %v386_v58  ;;  %v404_v15 = vsel %vm4092_vm14, 0, %v402_v59 }
  0x4d   : > { %v487_v63 = vclz %v3474_v34  ;;  %v4151_v37 = vmul.u32.u64.low %v4079_v24, %v566_v27  ;;  %v4152_v32 = vmul.u32.u64.high %v4079_v24, %v566_v27, %v4151_v37  ;;  %v408_v33 = vadd.s32 3, %v404_v15 }
  0x4e   : > { %v389_v46 = vshrl.u32 %v371_v28, %v387_v62  ;;  %v392_v14 = vadd.s32 127, %v391_v2  ;;  %v567_v28 = vsel %vm555_vm15, %v545_v55, %v548_v56  ;;  %v637_v55 = vadd.s32 1, %v4085_v35 }
  0x4f   : > { %v3475_v29 = vadd.s32 4294967294, %v487_v63  ;;  %v570_v47 = vsel %vm556_vm1, %v567_v28, %v569_v21  ;;  %v578_v57 = vmul.u32 %v4079_v24, %v562_v20  ;;  %v4164_v58 = vand.u32 8388607, %v627_v25 }
  0x50   : > { %v390_v19 = vor.u32 %v389_v46, %v388_v1  ;;  %v393_v22 = vshll.u32 %v392_v14, 23  ;;  %v4156_v31 = vmul.u32.u64.low %v4079_v24, %v570_v47  ;;  %v4157_v50 = vmul.u32.u64.high %v4079_v24, %v570_v47, %v4156_v31 }
  0x51   : > { %vm3476_vm6 = vcmp.lt.s32.totalorder %v3475_v29, 0  ;;  %v581_v61 = vadd.s32 1, %v4152_v32  ;;  %vm638_vm7 = vcmp.gt.s32.totalorder %v637_v55, 0  ;;  %v4171_v1 = vand.u32 3, %v404_v15 }
  0x52   : > { %v394_v41 = vor.u32 4788187, %v393_v22  ;;  %v397_v43 = vcvt.s32.f32 %v390_v19  ;;  %v490_v49 = vsel %vm3476_vm6, 0, %v3475_v29  ;;  %vm580_vm8 = vc.u32 %v4157_v50, %v4151_v37 }
  0x53   : > { %v491_v51 = vsub.s32 32, %v490_v49  ;;  %v492_v53 = vshll.u32 %v4105_v7, %v490_v49  ;;  %v495_v54 = vsub.s32 4294967266, %v490_v49  ;;  %v508_v7 = vsel %vm4126_vm5, 0, %v506_v9 }
  0x54   : > { %v395_v48 = vand.u32 2147483647, %v394_v41  ;;  %v639_v35 = vsel %vm638_vm7, %v637_v55, 0  ;;  %v582_v8 = vsel %vm580_vm8, %v581_v61, %v4152_v32  ;;  %v4176_v34 = vand.u32 3, %v408_v33 }
  0x55   : > { %v493_v59 = vshrl.u32 %v475_v11, %v491_v51  ;;  %v496_v60 = vadd.s32 127, %v495_v54  ;;  %v583_v12 = vadd.s32 %v582_v8, %v578_v57  ;;  %v641_v13 = vand.u32 31, %v639_v35 }
  0x56   : > { %v398_v56 = vmul.f32 %v397_v43, %v395_v48  ;;  %v512_v16 = vadd.s32 3, %v508_v7  ;;  %v4186_v28 = vshrl.u32 %v639_v35, 5  ;;  %vm825_vm9 = vcmp.lt.s32.totalorder %v4171_v1, 2 }
  0x57   : > { %v494_v24 = vor.u32 %v493_v59, %v492_v53  ;;  %v497_v2 = vshll.u32 %v496_v60, 23  ;;  %v584_v15 = vadd.s32 536870912, %v583_v12  ;;  %v642_v63 = vsub.s32 32, %v641_v13 }
  0x58   : > { %v399_v62 = vxor.u32 2147483648, %v398_v56  ;;  %v644_v3 = vshll.u32 %v3870_v36, %v641_v13  ;;  %v647_v19 = vshll.u32 %v3871_v38, %v641_v13  ;;  %v650_v22 = vshll.u32 %v3872_v40, %v641_v13 }
  0x59   : > { %v498_v14 = vor.u32 4788187, %v497_v2  ;;  %v501_v10 = vcvt.s32.f32 %v494_v24  ;;  %v4184_v23 = vshrl.u32 %v584_v15, 30  ;;  %v645_v45 = vshrl.u32 %v3871_v38, %v642_v63 }
  0x5a   : > { %v400_v11 = vsel %vm317_vm13, %v399_v62, %v398_v56  ;;  %v648_v29 = vshrl.u32 %v3872_v40, %v642_v63  ;;  %v651_v27 = vshrl.u32 %v3873_v42, %v642_v63  ;;  %v653_v39 = vshll.u32 %v3873_v42, %v641_v13 }
  0x5b   : > { %v403_v46 = vsel %vm4092_vm14, %v3978_v4, %v400_v11  ;;  %v499_v18 = vand.u32 2147483647, %v498_v14  ;;  %v654_v41 = vshrl.u32 %v3874_v44, %v642_v63  ;;  %v586_v43 = vshll.u32 %v4184_v23, 30 }
  0x5c   : > { %3789 = vcosq.f32 %v403_v46  ;;  %v643_v20 = vshrl.u32 %v3870_v36, %v642_v63  ;;  %v646_v21 = vor.u32 %v645_v45, %v644_v3  ;;  %v649_v47 = vor.u32 %v648_v29, %v647_v19 }
  0x5d   : > { %3791 = vsinq.f32 %v403_v46  ;;  %v502_v9 = vmul.f32 %v501_v10, %v499_v18  ;;  %vm407_vm10 = vweird.f32 %v3978_v4  ;;  %v652_v32 = vor.u32 %v651_v27, %v650_v22 }
  0x5e   : > { %v4197_v40 = vor.u32 %v654_v41, %v653_v39  ;;  %v4200_v48 = vshll.u32 %v3874_v44, %v641_v13  ;;  %vm826_vm11 = vcmp.eq.s32.totalorder %v4171_v1, 0  ;;  %vm829_vm12 = vcmp.eq.s32.totalorder %v4171_v1, 2 }
  0x5f   : > { %v503_v38 = vxor.u32 2147483648, %v502_v9  ;;  %v4204_v42 = vsub.s32 %v583_v12, %v586_v43  ;;  %v4207_v49 = vshrl.u32 %v3875_v52, %v642_v63  ;;  %vm410_vm13 = vcmp.lt.s32.totalorder %v4176_v34, 2 }
  0x60   : > { %v4212_v31 = vand.u32 3, %v512_v16  ;;  %v4214_v51 = vand.u32 3, %v508_v7  ;;  %vm659_vm14 = vcmp.lt.s32.totalorder %v4186_v28, 1  ;;  %vm662_vm15 = vcmp.lt.s32.totalorder %v4186_v28, 4 }
  0x61   : > { %v504_v36 = vsel %vm421_vm0, %v503_v38, %v502_v9  ;;  %v589_v53 = vsub.s32 0, %v4204_v42  ;;  %vm1371_vm1 = vcmask 1042432   ;;  %v658_v52 = vor.u32 %v4207_v49, %v4200_v48 }
  0x62   : > { %v507_v44 = vsel %vm4126_vm5, %v3980_v5, %v504_v36  ;;  %v663_v54 = vsel %vm659_vm14, %v643_v20, %v646_v21  ;;  %v664_v55 = vsel %vm662_vm15, %v652_v32, 2102212464  ;;  %vm414_vm0 = vcmp.eq.s32.totalorder %v4176_v34, 2 }
  0x63   : > { %3793 = vcosq.f32 %v507_v44  ;;  %v3478_v17 = vmin.u32 %v589_v53, %v4204_v42  ;;  %vm661_vm2 = vcmp.lt.s32.totalorder %v4186_v28, 3  ;;  %vm411_vm3 = vcmp.eq.s32.totalorder %v4176_v34, 0 }
  0x64   : > { %3795 = vsinq.f32 %v507_v44  ;;  %vm518_vm4 = vcmp.eq.s32.totalorder %v4212_v31, 2  ;;  %v665_v59 = vsel %vm661_vm2, %v649_v47, %v664_v55  ;;  %v635_v62 = vor.u32 8388608, %v4164_v58  ;;  %v4361_v58 = vld [vmem:[%s4831_s1] sm:$0xff] }
  0x65   : > { %v591_v61 = vclz %v3478_v17  ;;  %vm660_vm6 = vcmp.lt.s32.totalorder %v4186_v28, 2  ;;  %vm515_vm7 = vcmp.eq.s32.totalorder %v4212_v31, 0  ;;  %v4244_v24 = vadd.s32 %v4151_v37, %v4157_v50  ;;  %v4393_v28 = vld [vmem:[%s4831_s1 + $0x8] sm:$0xff] }
  0x66   : > { %v3790_v56 = vpop.eup %3789  ;;  %v4248_v2 = vsel %vm660_vm6, %v663_v54, %v665_v59  ;;  %vm514_vm5 = vcmp.lt.s32.totalorder %v4212_v31, 2  ;;  %v667_v13 = vsel %vm659_vm14, %v646_v21, %v649_v47  ;;  %vm1389_vm8 = vcmask 1040384  }
  0x67   : > { %v3792_v33 = vpop.eup %3791  ;;  %v415_v57 = vxor.u32 2147483648, %v3790_v56  ;;  %v3479_v12 = vadd.s32 4294967294, %v591_v61  ;;  %v668_v46 = vsel %vm662_vm15, %v4197_v40, 920167782  ;;  %v4266_v14 = vsel %vm659_vm14, %v649_v47, %v652_v32 }
  0x68   : > { %v412_v60 = vxor.u32 2147483648, %v3792_v33  ;;  %v669_v1 = vsel %vm661_vm2, %v652_v32, %v668_v46  ;;  %vm4846_vm14 = vcmp.eq.s32.totalorder %v4214_v51, 0 }
  0x69   : > { %v416_v7 = vsel %vm414_vm0, %v415_v57, %v3792_v33  ;;  %v831_v35 = vsel %vm829_vm12, %v415_v57, %v3792_v33  ;;  %vm1380_vm0 = vcmask 1045504   ;;  %vm928_vm12 = vcmp.lt.s32.totalorder %v4214_v51, 2 }
  0x6a   : > { %v413_v8 = vsel %vm411_vm3, %v3790_v56, %v412_v60  ;;  %v828_v11 = vsel %vm826_vm11, %v3790_v56, %v412_v60  ;;  %vm511_vm3 = vweird.f32 %v3980_v5  ;;  %vm1398_vm11 = vcmask 1043456  }
  0x6b   : > { %v417_v37 = vsel %vm410_vm13, %v413_v8, %v416_v7  ;;  %v832_v50 = vsel %vm825_vm9, %v828_v11, %v831_v35  ;;  %vm3480_vm13 = vcmp.lt.s32.totalorder %v3479_v12, 0  ;;  %vm1407_vm9 = vcmask 1046528  }
  0x6c   : > { %v418_v10 = vsel %vm407_vm10, nan, %v417_v37  ;;  %v833_v34 = vsel %vm407_vm10, nan, %v832_v50  ;;  %v4274_v22 = vsel %vm3480_vm13, 0, %v3479_v12  ;;  %v4278_v45 = vsel %vm660_vm6, %v667_v13, %v669_v1 }
  0x6d   : > { %v1143_v16 = vmul.f32 2.0, %v418_v10  ;;  %v1151_v15 = vmul.f32 %v833_v34, %v833_v34  ;;  %v1155_v63 = vmul.f32 %v418_v10, %v418_v10  ;;  %v1207_v3 = vcombine.high %v418_v10, %v418_v10  ;;  %v3794_v4 = vpop.eup %3793 }
  0x6e   : > { %v1219_v18 = vcombine.high %v833_v34, %v833_v34  ;;  %v1223_v19 = vrot.slane %v833_v34, 5  ;;  %v595_v27 = vsub.s32 32, %v4274_v22  ;;  %v596_v39 = vshll.u32 %v4204_v42, %v4274_v22  ;;  %v3796_v41 = vpop.eup %3795 }
  0x6f   : > { %v1147_v29 = vmul.f32 %v1143_v16, %v833_v34  ;;  %v1159_v9 = vsub.f32 %v1151_v15, %v1155_v63  ;;  %v519_v20 = vxor.u32 2147483648, %v3794_v4  ;;  %v599_v47 = vsub.s32 4294967266, %v4274_v22 }
  0x70   : > { %v1224_v43 = vrot.slane %v1219_v18, 5  ;;  %v1372_v21 = vsel %vm1371_vm1, %v418_v10, %v1223_v19  ;;  %v516_v55 = vxor.u32 2147483648, %v3796_v41  ;;  %vm4845_vm10 = vcmp.eq.s32.totalorder %v4214_v51, 2 }
  0x71   : > { %v1163_v38 = vmul.f32 2.0, %v1147_v29  ;;  %v1171_v32 = vmul.f32 %v1159_v9, %v1159_v9  ;;  %v1175_v36 = vmul.f32 %v1147_v29, %v1147_v29  ;;  %v1243_v44 = vcombine.high %v1147_v29, %v1147_v29 }
  0x72   : > { %v1267_v53 = vcombine.high %v1159_v9, %v1159_v9  ;;  %v1373_v54 = vsel %vm1371_vm1, %v1207_v3, %v1224_v43  ;;  %v520_v56 = vsel %vm518_vm4, %v519_v20, %v3796_v41  ;;  %v934_v59 = vsel %vm4845_vm10, %v519_v20, %v3796_v41 }
  0x73   : > { %v4288_v17 = vmul.f32 %v1163_v38, %v1159_v9  ;;  %v4290_v33 = vsub.f32 %v1171_v32, %v1175_v36  ;;  %v1248_v57 = vrot.slane %v1243_v44, 2  ;;  %v517_v61 = vsel %vm515_vm7, %v3794_v4, %v516_v55 }
  0x74   : > { %v1272_v60 = vrot.slane %v1267_v53, 7  ;;  %v931_v7 = vsel %vm4846_vm14, %v3794_v4, %v516_v55  ;;  %v1247_v35 = vrot.slane %v1147_v29, 2  ;;  %v521_v12 = vsel %vm514_vm5, %v517_v61, %v520_v56 }
  0x75   : > { %v1303_v8 = vcombine.high %v4290_v33, %v4290_v33  ;;  %v1382_v11 = vsel %vm1380_vm0, %v1373_v54, %v1248_v57  ;;  %v935_v13 = vsel %vm928_vm12, %v931_v7, %v934_v59  ;;  %v522_v50 = vsel %vm511_vm3, nan, %v521_v12 }
  0x76   : > { %v1391_v37 = vsel %vm1389_vm8, %v1248_v57, %v1272_v60  ;;  %v936_v46 = vsel %vm511_vm3, nan, %v935_v13  ;;  %v1271_v10 = vrot.slane %v1159_v9, 7  ;;  %v1144_v16 = vmul.f32 2.0, %v522_v50 }
  0x77   : > { %v4310_v34 = vrot.slane %v1303_v8, 1  ;;  %v1400_v1 = vsel %vm1398_vm11, %v1391_v37, %v4288_v17  ;;  %v1152_v31 = vmul.f32 %v936_v46, %v936_v46  ;;  %v1156_v15 = vmul.f32 %v522_v50, %v522_v50 }
  0x78   : > { %v1208_v63 = vcombine.high %v522_v50, %v522_v50  ;;  %v1220_v51 = vcombine.high %v936_v46, %v936_v46  ;;  %v1291_v3 = vcombine.low %v4288_v17, %v4288_v17  ;;  %v1148_v19 = vmul.f32 %v1144_v16, %v936_v46 }
  0x79   : > { %v1409_v18 = vsel %vm1407_vm9, %v1400_v1, %v4310_v34  ;;  %v1307_v5 = vrot.slane %v4290_v33, 1  ;;  %v1381_v4 = vsel %vm1380_vm0, %v1372_v21, %v1247_v35  ;;  %v1160_v9 = vsub.f32 %v1152_v31, %v1156_v15 }
  0x7a   : > { %v3579_v29 = vpack.c.bf16 %v1409_v18, %v1382_v11  ;;  %v1226_v41 = vrot.slane %v1220_v51, 5  ;;  %v1390_v43 = vsel %vm1389_vm8, %v1247_v35, %v1271_v10  ;;  %v1164_v20 = vmul.f32 2.0, %v1148_v19 }
  0x7b   : > { %v1176_v38 = vmul.f32 %v1148_v19, %v1148_v19  ;;  %v1244_v32 = vcombine.high %v1148_v19, %v1148_v19  ;;  %v1399_v36 = vsel %vm1398_vm11, %v1390_v43, %v1291_v3  ;;  %v1172_v44 = vmul.f32 %v1160_v9, %v1160_v9 }
  0x7c   : > { %3580 = vmatprep.subr.bf16.mxu0 %v3579_v29  ;;  %v1268_v53 = vcombine.high %v1160_v9, %v1160_v9  ;;  %v1375_v54 = vsel %vm1371_vm1, %v1208_v63, %v1226_v41  ;;  %v1408_v55 = vsel %vm1407_vm9, %v1399_v36, %v1307_v5  ;;  %vm1416_vm4 = vcmask 1041408  }
  0x7d   : > { %v1168_v21 = vmul.f32 %v1164_v20, %v1160_v9  ;;  %v1250_v56 = vrot.slane %v1244_v32, 2  ;;  %v3581_v57 = vpack.c.bf16 %v1408_v55, %v1381_v4  ;;  %v1225_v59 = vrot.slane %v936_v46, 5 }
  0x7e   : > { %v1180_v60 = vsub.f32 %v1172_v44, %v1176_v38  ;;  %v1274_v61 = vrot.slane %v1268_v53, 7  ;;  %v1249_v7 = vrot.slane %v1148_v19, 2  ;;  %v1273_v35 = vrot.slane %v1160_v9, 7 }
  0x7f   : > { %vm1425_vm5 = vcmask 1044480   ;;  %v1384_v8 = vsel %vm1380_vm0, %v1375_v54, %v1250_v56  ;;  %3582 = vmatpush1.bf16.msra.mxu0 %v3581_v57  ;;  %v1292_v11 = vcombine.low %v1168_v21, %v1168_v21  ;;  %v1374_v12 = vsel %vm1371_vm1, %v522_v50, %v1225_v59 }
  0x80   : > { %v1183_v13 = vmul.f32 2.0, %v4288_v17  ;;  %v1304_v37 = vcombine.high %v1180_v60, %v1180_v60  ;;  %v1393_v10 = vsel %vm1389_vm8, %v1250_v56, %v1274_v61  ;;  %v1309_v1 = vrot.slane %v1180_v60, 1 }
  0x81   : > { %v1383_v16 = vsel %vm1380_vm0, %v1374_v12, %v1249_v7  ;;  %v1402_v46 = vsel %vm1398_vm11, %v1393_v10, %v1168_v21  ;;  %v1392_v31 = vsel %vm1389_vm8, %v1249_v7, %v1273_v35  ;;  %v1191_v63 = vmul.f32 %v4290_v33, %v4290_v33 }
  0x82   : > { %v1187_v15 = vmul.f32 %v1183_v13, %v4290_v33  ;;  %v1310_v51 = vrot.slane %v1304_v37, 1  ;;  %v1401_v50 = vsel %vm1398_vm11, %v1392_v31, %v1292_v11  ;;  %v1195_v3 = vmul.f32 %v4288_v17, %v4288_v17 }
  0x83   : > { %v1184_v18 = vmul.f32 2.0, %v1168_v21  ;;  %vm1438_vm7 = vcmask 195584   ;;  %v1410_v19 = vsel %vm1407_vm9, %v1401_v50, %v1309_v1  ;;  %v1192_v29 = vmul.f32 %v1180_v60, %v1180_v60 }
  0x84   : > { %v1327_v4 = vcombine.high %v1187_v15, %v1187_v15  ;;  %v1196_v9 = vmul.f32 %v1168_v21, %v1168_v21  ;;  %v1411_v41 = vsel %vm1407_vm9, %v1402_v46, %v1310_v51  ;;  %v3585_v43 = vpack.c.bf16 %v1410_v19, %v1383_v16 }
  0x85   : > { %v1199_v20 = vsub.f32 %v1191_v63, %v1195_v3  ;;  %v1188_v38 = vmul.f32 %v1184_v18, %v1180_v60  ;;  %v3583_v32 = vpack.c.bf16 %v1411_v41, %v1384_v8  ;;  %v1331_v53 = vrot.slane %v1187_v15, 6 }
  0x86   : > { %v1332_v36 = vrot.slane %v1327_v4, 6  ;;  %v1200_v44 = vsub.f32 %v1192_v29, %v1196_v9  ;;  %v675_v8 = vshll.u32 %v635_v62, 8  ;;  %v600_v33 = vadd.s32 127, %v599_v47 }
  0x87   : > { %v1351_v54 = vcombine.high %v1199_v20, %v1199_v20  ;;  %v1328_v55 = vcombine.high %v1188_v38, %v1188_v38  ;;  %v1355_v56 = vrot.slane %v1199_v20, 3  ;;  %v1333_v17 = vrot.slane %v1188_v38, 6  ;;  %3584 = vmatprep.subr.bf16.mxu1 %v3583_v32 }
  0x88   : > { %v1418_v57 = vsel %vm1416_vm4, %v4310_v34, %v1332_v36  ;;  %v1352_v59 = vcombine.high %v1200_v44, %v1200_v44  ;;  %v1417_v21 = vsel %vm1416_vm4, %v1307_v5, %v1331_v53  ;;  %v1357_v61 = vrot.slane %v1200_v44, 3  ;;  %3586 = vmatpush1.bf16.msra.mxu1 %v3585_v43 }
  0x89   : > { %v1356_v60 = vrot.slane %v1351_v54, 3  ;;  %v1334_v7 = vrot.slane %v1328_v55, 6  ;;  %v1419_v35 = vsel %vm1416_vm4, %v1309_v1, %v1333_v17  ;;  %v1426_v12 = vsel %vm1425_vm5, %v1417_v21, %v1355_v56 }
  0x8a   : > { %v1358_v11 = vrot.slane %v1352_v59, 3  ;;  %v597_v34 = vshrl.u32 %v4244_v24, %v595_v27  ;;  %v1428_v37 = vsel %vm1425_vm5, %v1419_v35, %v1357_v61  ;;  %v672_v62 = vsel %vm662_vm15, %v658_v52, 1326507024 }
  0x8b   : > { %v1427_v5 = vsel %vm1425_vm5, %v1418_v57, %v1356_v60  ;;  %v1420_v13 = vsel %vm1416_vm4, %v1310_v51, %v1334_v7  ;;  %v601_v47 = vshll.u32 %v600_v33, 23  ;;  %v673_v10 = vsel %vm661_vm2, %v4197_v40, %v672_v62 }
  0x8c   : > { %1455 = vmatprep.subr.mxu0 %v1427_v5  ;;  %v1429_v24 = vsel %vm1425_vm5, %v1420_v13, %v1358_v11  ;;  %v598_v27 = vor.u32 %v597_v34, %v596_v39  ;;  %v674_v48 = vsel %vm660_vm6, %v4266_v14, %v673_v10  ;;  %v609_v14 = vsub.s32 4, %v4184_v23 }
  0x8d   : > { %1544 = vmatprep.subr.mxu1 %v1429_v24  ;;  %1456 = vmatpush1.msra.mxu0 %v1426_v12  ;;  %v4379_v49 = vmul.u32.u64.low %v675_v8, %v4278_v45  ;;  %v4380_v52 = vmul.u32.u64.high %v675_v8, %v4278_v45, %v4379_v49  ;;  %v602_v42 = vor.u32 4788187, %v601_v47  ;;  %v682_v45 = vmul.u32 %v675_v8, %v4248_v2  ;;  %v4413_v2 = vld [vmem:[%s4831_s1 + $0x10] sm:$0xff] }
  0x8e   : > { %1545 = vmatpush1.msra.mxu1 %v1428_v37  ;;  %3501 = vmatmul.mubr.msk.f32.vlgmr.msra.gmra.mrb[0].mxu0 %vm1438_vm7, %v4361_v58  ;;  %v605_v22 = vcvt.s32.f32 %v598_v27  ;;  %v4384_v39 = vmul.u32.u64.low %v675_v8, %v674_v48  ;;  %v4385_v1 = vmul.u32.u64.high %v675_v8, %v674_v48, %v4384_v39  ;;  %vm525_vm2 = vcmp.lt.s32.totalorder %v3982_v6, 0 }
  0x8f   : > { %3505 = vmatmul.mubr.msk.f32.vlgmr.msra.gmra.mrb[0].mxu1 %vm1438_vm7, %v4361_v58  ;;  %1521 = vmatprep.mubr.f32.mxu0 %v3869_v0  ;;  %v603_v40 = vand.u32 2147483647, %v602_v42  ;;  %v685_v16 = vadd.s32 1, %v4380_v52  ;;  %vm524_vm6 = vcmp.le.f32.partialorder %v523_v26, 0.7853982  ;;  %v610_v51 = vsel %vm525_vm2, %v609_v14, %v4184_v23  ;;  %v4428_v26 = vld [vmem:[%s4831_s1 + $0x18] sm:$0xff] }
  0x90   : > { %1610 = vmatprep.mubr.f32.mxu1 %v3869_v0  ;;  %v4402_v31 = vadd.s32 %v4379_v49, %v4385_v1  ;;  %vm684_vm15 = vc.u32 %v4385_v1, %v4379_v49  ;;  %v612_v4 = vsel %vm524_vm6, 0, %v610_v51 }
  0x91   : > { %v606_v46 = vmul.f32 %v605_v22, %v603_v40  ;;  %v686_v15 = vsel %vm684_vm15, %v685_v16, %v4380_v52  ;;  %v616_v29 = vadd.s32 3, %v612_v4  ;;  %v1030_v20 = vand.u32 3, %v612_v4 }
  0x92   : > { %3502 = vmatmul.mubr.msk.f32.gmra.mrb[2].mxu0 %vm1438_vm7, %v4393_v28  ;;  %v687_v50 = vadd.s32 %v686_v15, %v682_v45 }
  0x93   : > { %3506 = vmatmul.mubr.msk.f32.gmra.mrb[2].mxu1 %vm1438_vm7, %v4393_v28  ;;  %1527 = vmatprep.mubr.f32.mxu0 %v3869_v0  ;;  %v607_v63 = vxor.u32 2147483648, %v606_v46  ;;  %v617_v43 = vand.u32 3, %v616_v29  ;;  %vm1035_vm3 = vcmp.eq.s32.totalorder %v1030_v20, 2  ;;  %vm1032_vm10 = vcmp.eq.s32.totalorder %v1030_v20, 0 }
  0x94   : > { %1616 = vmatprep.mubr.f32.mxu1 %v3869_v0  ;;  %v688_v18 = vadd.s32 536870912, %v687_v50  ;;  %vm1031_vm15 = vcmp.lt.s32.totalorder %v1030_v20, 2 }
  0x95   : > { %v608_v3 = vsel %vm525_vm2, %v607_v63, %v606_v46  ;;  %vm622_vm12 = vcmp.eq.s32.totalorder %v617_v43, 2  ;;  %vm619_vm13 = vcmp.eq.s32.totalorder %v617_v43, 0  ;;  %vm618_vm14 = vcmp.lt.s32.totalorder %v617_v43, 2 }
  0x96   : > { %3503 = vmatmul.mubr.msk.f32.gmra.mrb[4].mxu0 %vm1438_vm7, %v4413_v2  ;;  %v611_v19 = vsel %vm524_vm6, %v3982_v6, %v608_v3  ;;  %v4430_v23 = vshrl.u32 %v688_v18, 30  ;;  %vm615_vm2 = vweird.f32 %v3982_v6 }
  0x97   : > { %3507 = vmatmul.mubr.msk.f32.gmra.mrb[4].mxu1 %vm1438_vm7, %v4413_v2  ;;  %1533 = vmatprep.mubr.f32.mxu0 %v3869_v0  ;;  %3797 = vcosq.f32 %v611_v19 }
  0x98   : > { %1622 = vmatprep.mubr.f32.mxu1 %v3869_v0  ;;  %3799 = vsinq.f32 %v611_v19  ;;  %v690_v9 = vshll.u32 %v4430_v23, 30  ;;  %v713_v52 = vsub.s32 4, %v4430_v23 }
  0x9a   : > { %3504 = vmatmul.mubr.msk.f32.gmra.mrb[6].mxu0 %vm1438_vm7, %v4428_v26  ;;  %v691_v41 = vsub.s32 %v687_v50, %v690_v9 }
  0x9b   : > { %3508 = vmatmul.mubr.msk.f32.gmra.mrb[6].mxu1 %vm1438_vm7, %v4428_v26  ;;  %1693 = vmatprep.mubr.f32.mxu0 %v3869_v0 }
  0x9c   : > { %1782 = vmatprep.mubr.f32.mxu1 %v3869_v0  ;;  %v693_v38 = vsub.s32 0, %v691_v41 }
  0x9e   : > { %v3482_v32 = vmin.u32 %v693_v38, %v691_v41 }
  0xa0   : > { %v695_v44 = vclz %v3482_v32 }
  0xa1   : > { %v3798_v36 = vpop.eup %3797 }
  0xa2   : > { %v3800_v53 = vpop.eup %3799  ;;  %v623_v54 = vxor.u32 2147483648, %v3798_v36  ;;  %v3483_v56 = vadd.s32 4294967294, %v695_v44 }
  0xa3   : > { %v620_v55 = vxor.u32 2147483648, %v3800_v53 }
  0xa4   : > { %v624_v17 = vsel %vm622_vm12, %v623_v54, %v3800_v53  ;;  %v1037_v57 = vsel %vm1035_vm3, %v623_v54, %v3800_v53  ;;  %vm3484_vm6 = vcmp.lt.s32.totalorder %v3483_v56, 0  ;;  %vm629_vm12 = vcmp.lt.s32.totalorder %v3994_v30, 0 }
  0xa5   : > { %v621_v59 = vsel %vm619_vm13, %v3798_v36, %v620_v55  ;;  %v1034_v21 = vsel %vm1032_vm10, %v3798_v36, %v620_v55  ;;  %v698_v7 = vsel %vm3484_vm6, 0, %v3483_v56  ;;  %vm628_vm3 = vcmp.le.f32.partialorder %v627_v25, 0.7853982 }
  0xa6   : > { %v625_v61 = vsel %vm618_vm14, %v621_v59, %v624_v17  ;;  %v1038_v60 = vsel %vm1031_vm15, %v1034_v21, %v1037_v57  ;;  %v699_v11 = vsub.s32 32, %v698_v7  ;;  %v700_v12 = vshll.u32 %v691_v41, %v698_v7 }
  0xa7   : > { %v626_v35 = vsel %vm615_vm2, nan, %v625_v61  ;;  %v1039_v8 = vsel %vm615_vm2, nan, %v1038_v60  ;;  %v703_v6 = vsub.s32 4294967266, %v698_v7  ;;  %v714_v7 = vsel %vm629_vm12, %v713_v52, %v4430_v23 }
  0xa8   : > { %v1145_v34 = vmul.f32 2.0, %v626_v35  ;;  %v1153_v33 = vmul.f32 %v1039_v8, %v1039_v8  ;;  %v1157_v5 = vmul.f32 %v626_v35, %v626_v35  ;;  %v1209_v13 = vcombine.high %v626_v35, %v626_v35 }
  0xa9   : > { %v1221_v37 = vcombine.high %v1039_v8, %v1039_v8  ;;  %v701_v62 = vshrl.u32 %v4402_v31, %v699_v11  ;;  %v1227_v24 = vrot.slane %v1039_v8, 5  ;;  %v704_v49 = vadd.s32 127, %v703_v6 }
  0xaa   : > { %v1149_v27 = vmul.f32 %v1145_v34, %v1039_v8  ;;  %v1161_v47 = vsub.f32 %v1153_v33, %v1157_v5  ;;  %v716_v25 = vsel %vm628_vm3, 0, %v714_v7 }
  0xab   : > { %v1228_v10 = vrot.slane %v1221_v37, 5  ;;  %v702_v48 = vor.u32 %v701_v62, %v700_v12  ;;  %v705_v45 = vshll.u32 %v704_v49, 23  ;;  %v1376_v16 = vsel %vm1371_vm1, %v626_v35, %v1227_v24 }
  0xac   : > { %v1165_v42 = vmul.f32 2.0, %v1149_v27  ;;  %v1173_v22 = vmul.f32 %v1161_v47, %v1161_v47  ;;  %v1177_v39 = vmul.f32 %v1149_v27, %v1149_v27  ;;  %v1245_v1 = vcombine.high %v1149_v27, %v1149_v27 }
  0xad   : > { %v1269_v40 = vcombine.high %v1161_v47, %v1161_v47  ;;  %v1377_v14 = vsel %vm1371_vm1, %v1209_v13, %v1228_v10  ;;  %v1251_v63 = vrot.slane %v1149_v27, 2  ;;  %v706_v50 = vor.u32 4788187, %v705_v45 }
  0xae   : > { %v1169_v46 = vmul.f32 %v1165_v42, %v1161_v47  ;;  %v1181_v31 = vsub.f32 %v1173_v22, %v1177_v39  ;;  %v1252_v15 = vrot.slane %v1245_v1, 2  ;;  %v709_v3 = vcvt.s32.f32 %v702_v48 }
  0xaf   : > { %v1276_v51 = vrot.slane %v1269_v40, 7  ;;  %v1275_v18 = vrot.slane %v1161_v47, 7  ;;  %v707_v43 = vand.u32 2147483647, %v706_v50  ;;  %v1385_v20 = vsel %vm1380_vm0, %v1376_v16, %v1251_v63 }
  0xb0   : > { %v1305_v19 = vcombine.high %v1181_v31, %v1181_v31  ;;  %v1386_v4 = vsel %vm1380_vm0, %v1377_v14, %v1252_v15  ;;  %v1293_v29 = vcombine.low %v1169_v46, %v1169_v46  ;;  %v1311_v9 = vrot.slane %v1181_v31, 1 }
  0xb1   : > { %v1395_v41 = vsel %vm1389_vm8, %v1252_v15, %v1276_v51  ;;  %v1394_v38 = vsel %vm1389_vm8, %v1251_v63, %v1275_v18  ;;  %v1185_v53 = vmul.f32 2.0, %v1169_v46  ;;  %v710_v54 = vmul.f32 %v709_v3, %v707_v43 }
  0xb2   : > { %v1312_v32 = vrot.slane %v1305_v19, 1  ;;  %v1404_v36 = vsel %vm1398_vm11, %v1395_v41, %v1169_v46  ;;  %v1403_v44 = vsel %vm1398_vm11, %v1394_v38, %v1293_v29  ;;  %v1193_v56 = vmul.f32 %v1181_v31, %v1181_v31 }
  0xb3   : > { %v1412_v55 = vsel %vm1407_vm9, %v1403_v44, %v1311_v9  ;;  %v1197_v17 = vmul.f32 %v1169_v46, %v1169_v46  ;;  %v1189_v21 = vmul.f32 %v1185_v53, %v1181_v31  ;;  %v711_v60 = vxor.u32 2147483648, %v710_v54 }
  0xb4   : > { %v1413_v57 = vsel %vm1407_vm9, %v1404_v36, %v1312_v32  ;;  %v3589_v59 = vpack.c.bf16 %v1412_v55, %v1385_v20  ;;  %v720_v24 = vadd.s32 3, %v716_v25  ;;  %v1133_v10 = vand.u32 3, %v716_v25 }
  0xb5   : > { %v3587_v61 = vpack.c.bf16 %v1413_v57, %v1386_v4  ;;  %v1201_v35 = vsub.f32 %v1193_v56, %v1197_v17  ;;  %v1329_v8 = vcombine.high %v1189_v21, %v1189_v21  ;;  %v1335_v11 = vrot.slane %v1189_v21, 6 }
  0xb6   : > { %v712_v12 = vsel %vm629_vm12, %v711_v60, %v710_v54  ;;  %v721_v47 = vand.u32 3, %v720_v24  ;;  %vm1138_vm10 = vcmp.eq.s32.totalorder %v1133_v10, 2  ;;  %vm1135_vm15 = vcmp.eq.s32.totalorder %v1133_v10, 0 }
  0xb7   : > { %3588 = vmatprep.subr.bf16.mxu0 %v3587_v61  ;;  %v1353_v34 = vcombine.high %v1201_v35, %v1201_v35  ;;  %v1359_v33 = vrot.slane %v1201_v35, 3  ;;  %v715_v5 = vsel %vm628_vm3, %v3994_v30, %v712_v12  ;;  %v1336_v13 = vrot.slane %v1329_v8, 6 }
  0xb8   : > { %3590 = vmatpush1.bf16.msra.mxu0 %v3589_v59  ;;  %v1421_v37 = vsel %vm1416_vm4, %v1311_v9, %v1335_v11  ;;  %3801 = vcosq.f32 %v715_v5  ;;  %vm726_vm13 = vcmp.eq.s32.totalorder %v721_v47, 2  ;;  %vm723_vm14 = vcmp.eq.s32.totalorder %v721_v47, 0 }
  0xb9   : > { %v1360_v62 = vrot.slane %v1353_v34, 3  ;;  %3803 = vsinq.f32 %v715_v5  ;;  %v1422_v23 = vsel %vm1416_vm4, %v1312_v32, %v1336_v13  ;;  %v1430_v6 = vsel %vm1425_vm5, %v1421_v37, %v1359_v33 }
  0xba   : > { %vm722_vm2 = vcmp.lt.s32.totalorder %v721_v47, 2  ;;  %vm1134_vm6 = vcmp.lt.s32.totalorder %v1133_v10, 2  ;;  %vm719_vm12 = vweird.f32 %v3994_v30 }
  0xbb   : > { %v1431_v27 = vsel %vm1425_vm5, %v1422_v23, %v1360_v62 }
  0xbc   : > { %1633 = vmatprep.subr.mxu0 %v1431_v27 }
  0xbd   : > { %1634 = vmatpush1.msra.mxu0 %v1430_v6 }
  0xbe   : > { %3509 = vmatmul.mubr.msk.f32.vlgmr.msra.gmra.mrb[8].mxu0 %vm1438_vm7, %v4361_v58 }
  0xbf   : > { %1699 = vmatprep.mubr.f32.mxu0 %v3869_v0 }
  0xc2   : > { %3510 = vmatmul.mubr.msk.f32.gmra.mrb[10].mxu0 %vm1438_vm7, %v4393_v28  ;;  %v3802_v48 = vpop.eup %3801 }
  0xc3   : > { %1705 = vmatprep.mubr.f32.mxu0 %v3869_v0  ;;  %v3804_v49 = vpop.eup %3803  ;;  %v727_v52 = vxor.u32 2147483648, %v3802_v48 }
  0xc4   : > { %v724_v42 = vxor.u32 2147483648, %v3804_v49 }
  0xc5   : > { %v728_v22 = vsel %vm726_vm13, %v727_v52, %v3804_v49  ;;  %v1140_v39 = vsel %vm1138_vm10, %v727_v52, %v3804_v49 }
  0xc6   : > { %3511 = vmatmul.mubr.msk.f32.gmra.mrb[12].mxu0 %vm1438_vm7, %v4413_v2  ;;  %v725_v1 = vsel %vm723_vm14, %v3802_v48, %v724_v42  ;;  %v1137_v40 = vsel %vm1135_vm15, %v3802_v48, %v724_v42 }
  0xc7   : > { %1711 = vmatprep.mubr.f32.mxu0 %v3869_v0  ;;  %v729_v14 = vsel %vm722_vm2, %v725_v1, %v728_v22  ;;  %v1141_v45 = vsel %vm1134_vm6, %v1137_v40, %v1140_v39 }
  0xc8   : > { %v730_v16 = vsel %vm719_vm12, nan, %v729_v14  ;;  %v1142_v46 = vsel %vm719_vm12, nan, %v1141_v45 }
  0xc9   : > { %v1146_v31 = vmul.f32 2.0, %v730_v16  ;;  %v1154_v15 = vmul.f32 %v1142_v46, %v1142_v46  ;;  %v1158_v63 = vmul.f32 %v730_v16, %v730_v16  ;;  %v1210_v30 = vcombine.high %v730_v16, %v730_v16 }
  0xca   : > { %3512 = vmatmul.mubr.msk.f32.gmra.mrb[14].mxu0 %vm1438_vm7, %v4428_v26  ;;  %v1222_v51 = vcombine.high %v1142_v46, %v1142_v46  ;;  %v1229_v50 = vrot.slane %v1142_v46, 5 }
  0xcb   : > { %1920 = vmatprep.mubr.f32.mxu0 %v3869_v0  ;;  %v1150_v3 = vmul.f32 %v1146_v31, %v1142_v46  ;;  %v1162_v18 = vsub.f32 %v1154_v15, %v1158_v63 }
  0xcc   : > { %v1230_v19 = vrot.slane %v1222_v51, 5  ;;  %v1378_v4 = vsel %vm1371_vm1, %v730_v16, %v1229_v50 }
  0xcd   : > { %v1166_v29 = vmul.f32 2.0, %v1150_v3  ;;  %v1174_v9 = vmul.f32 %v1162_v18, %v1162_v18  ;;  %v1178_v41 = vmul.f32 %v1150_v3, %v1150_v3  ;;  %v1246_v43 = vcombine.high %v1150_v3, %v1150_v3 }
  0xce   : > { %v1270_v20 = vcombine.high %v1162_v18, %v1162_v18  ;;  %v1379_v38 = vsel %vm1371_vm1, %v1210_v30, %v1230_v19  ;;  %v1253_v32 = vrot.slane %v1150_v3, 2  ;;  %v1277_v36 = vrot.slane %v1162_v18, 7 }
  0xcf   : > { %v1170_v44 = vmul.f32 %v1166_v29, %v1162_v18  ;;  %v1182_v53 = vsub.f32 %v1174_v9, %v1178_v41  ;;  %v1254_v54 = vrot.slane %v1246_v43, 2  ;;  %vm1843_vm1 = vcmask 261120  }
  0xd0   : > { %v1278_v55 = vrot.slane %v1270_v20, 7  ;;  %v1387_v56 = vsel %vm1380_vm0, %v1378_v4, %v1253_v32  ;;  %v1396_v17 = vsel %vm1389_vm8, %v1253_v32, %v1277_v36 }
  0xd1   : > { %v1306_v57 = vcombine.high %v1182_v53, %v1182_v53  ;;  %v1388_v59 = vsel %vm1380_vm0, %v1379_v38, %v1254_v54  ;;  %v1294_v21 = vcombine.low %v1170_v44, %v1170_v44  ;;  %v1313_v61 = vrot.slane %v1182_v53, 1 }
  0xd2   : > { %v1397_v60 = vsel %vm1389_vm8, %v1254_v54, %v1278_v55  ;;  %v1186_v7 = vmul.f32 2.0, %v1170_v44  ;;  %v1194_v35 = vmul.f32 %v1182_v53, %v1182_v53  ;;  %v1198_v8 = vmul.f32 %v1170_v44, %v1170_v44 }
  0xd3   : > { %v1314_v11 = vrot.slane %v1306_v57, 1  ;;  %v1406_v12 = vsel %vm1398_vm11, %v1397_v60, %v1170_v44  ;;  %v1405_v34 = vsel %vm1398_vm11, %v1396_v17, %v1294_v21  ;;  %v4508_v60 = vld [vmem:[%s4832_s2] sm:$0xff] }
  0xd4   : > { %v1414_v33 = vsel %vm1407_vm9, %v1405_v34, %v1313_v61  ;;  %v1190_v5 = vmul.f32 %v1186_v7, %v1182_v53  ;;  %v1202_v25 = vsub.f32 %v1194_v35, %v1198_v8  ;;  %v4518_v7 = vld [vmem:[%s4832_s2 + $0x8] sm:$0xff]  ;;  %v4529_v35 = vld [vmem:[%s4832_s2 + $0x10] sm:$0xff]  ;;  %v4540_v8 = vld [vmem:[%s4832_s2 + $0x18] sm:$0xff] }
  0xd5   : > { %v1415_v13 = vsel %vm1407_vm9, %v1406_v12, %v1314_v11  ;;  %v3593_v37 = vpack.c.bf16 %v1414_v33, %v1387_v56 }
  0xd6   : > { %v3591_v62 = vpack.c.bf16 %v1415_v13, %v1388_v59  ;;  %v1330_v23 = vcombine.high %v1190_v5, %v1190_v5  ;;  %v1354_v6 = vcombine.high %v1202_v25, %v1202_v25  ;;  %v1337_v24 = vrot.slane %v1190_v5, 6 }
  0xd7   : > { %v1361_v27 = vrot.slane %v1202_v25, 3 }
  0xd8   : > { %3592 = vmatprep.subr.bf16.mxu1 %v3591_v62  ;;  %v1338_v47 = vrot.slane %v1330_v23, 6  ;;  %v1362_v10 = vrot.slane %v1354_v6, 3  ;;  %v1423_v48 = vsel %vm1416_vm4, %v1313_v61, %v1337_v24 }
  0xd9   : > { %3594 = vmatpush1.bf16.msra.mxu1 %v3593_v37  ;;  %v1432_v49 = vsel %vm1425_vm5, %v1423_v48, %v1361_v27 }
  0xda   : > { %v1424_v52 = vsel %vm1416_vm4, %v1314_v11, %v1338_v47 }
  0xdb   : > { %v1433_v42 = vsel %vm1425_vm5, %v1424_v52, %v1362_v10 }
  0xdc   : > { %1722 = vmatprep.subr.mxu1 %v1433_v42 }
  0xdd   : > { %1723 = vmatpush1.msra.mxu1 %v1432_v49 }
  0xde   : > { %3513 = vmatmul.mubr.msk.f32.vlgmr.msra.gmra.mrb[8].mxu1 %vm1438_vm7, %v4361_v58 }
  0xdf   : > { %1788 = vmatprep.mubr.f32.mxu1 %v3869_v0 }
  0xe2   : > { %3514 = vmatmul.mubr.msk.f32.gmra.mrb[10].mxu1 %vm1438_vm7, %v4393_v28 }
  0xe3   : > { %1794 = vmatprep.mubr.f32.mxu1 %v3869_v0 }
  0xe6   : > { %3515 = vmatmul.mubr.msk.f32.gmra.mrb[12].mxu1 %vm1438_vm7, %v4413_v2 }
  0xe7   : > { %1800 = vmatprep.mubr.f32.mxu1 %v3869_v0 }
  0xea   : > { %3516 = vmatmul.mubr.msk.f32.gmra.mrb[14].mxu1 %vm1438_vm7, %v4428_v26 }
  0xeb   : > { %2009 = vmatprep.mubr.f32.mxu1 %v3869_v0 }
 0x161   : > { %v1517_v22 = vpop.f32.mrb[0].mxu0 }
 0x162   : > { %v1606_v39 = vpop.f32.mrb[0].mxu1  ;;  %v1519_v58 = vpop.f32.mrb[1].mxu0  ;;  %v1807_v14 = vmax.f32 %v1517_v22, 0.0 }
 0x163   : > { %v1608_v1 = vpop.f32.mrb[1].mxu1  ;;  %v1809_v46 = vmax.f32 %v1606_v39, 0.0  ;;  %v1808_v31 = vmax.f32 %v1519_v58, 0.0 }
 0x164   : > { %v1810_v30 = vmax.f32 %v1608_v1, 0.0 }
 0x165   : > { %v1523_v40 = vpop.f32.mrb[2].mxu0 }
 0x166   : > { %v1815_v45 = vmax.f32 %v1523_v40, 0.0  ;;  %v1612_v28 = vpop.f32.mrb[2].mxu1  ;;  %v1525_v16 = vpop.f32.mrb[3].mxu0 }
 0x167   : > { %v1817_v15 = vmax.f32 %v1612_v28, 0.0  ;;  %v1816_v2 = vmax.f32 %v1525_v16, 0.0  ;;  %v1614_v63 = vpop.f32.mrb[3].mxu1 }
 0x168   : > { %v3597_v51 = vpack.c.bf16 %v1815_v45, %v1807_v14  ;;  %v1818_v50 = vmax.f32 %v1614_v63, 0.0 }
 0x169   : > { %v3605_v26 = vpack.c.bf16 %v1817_v15, %v1809_v46  ;;  %v3595_v3 = vpack.c.bf16 %v1816_v2, %v1808_v31  ;;  %v1529_v18 = vpop.f32.mrb[4].mxu0 }
 0x16a   : > { %v3603_v19 = vpack.c.bf16 %v1818_v50, %v1810_v30  ;;  %v1618_v4 = vpop.f32.mrb[4].mxu1  ;;  %v1531_v29 = vpop.f32.mrb[5].mxu0  ;;  %v1823_v43 = vmax.f32 %v1529_v18, 0.0 }
 0x16b   : > { %v1620_v9 = vpop.f32.mrb[5].mxu1  ;;  %3596 = vmatprep.subr.bf16.mxu0 %v3595_v3  ;;  %v1825_v36 = vmax.f32 %v1618_v4, 0.0  ;;  %v1824_v44 = vmax.f32 %v1531_v29, 0.0 }
 0x16c   : > { %3604 = vmatprep.subr.bf16.mxu1 %v3603_v19  ;;  %3598 = vmatpush1.bf16.msra.mxu0 %v3597_v51  ;;  %v1826_v56 = vmax.f32 %v1620_v9, 0.0 }
 0x16d   : > { %3606 = vmatpush1.bf16.msra.mxu1 %v3605_v26  ;;  %v1535_v41 = vpop.f32.mrb[6].mxu0 }
 0x16e   : > { %v1831_v20 = vmax.f32 %v1535_v41, 0.0  ;;  %v1624_v38 = vpop.f32.mrb[6].mxu1  ;;  %v1537_v32 = vpop.f32.mrb[7].mxu0 }
 0x16f   : > { %v1833_v53 = vmax.f32 %v1624_v38, 0.0  ;;  %v1832_v54 = vmax.f32 %v1537_v32, 0.0  ;;  %v1626_v55 = vpop.f32.mrb[7].mxu1 }
 0x170   : > { %v3601_v17 = vpack.c.bf16 %v1831_v20, %v1823_v43  ;;  %v1834_v57 = vmax.f32 %v1626_v55, 0.0 }
 0x171   : > { %v3609_v59 = vpack.c.bf16 %v1833_v53, %v1825_v36  ;;  %v3599_v21 = vpack.c.bf16 %v1832_v54, %v1824_v44 }
 0x172   : > { %v3607_v61 = vpack.c.bf16 %v1834_v57, %v1826_v56 }
 0x173   : > { %3600 = vmatprep.subr.bf16.mxu0 %v3599_v21 }
 0x174   : > { %3608 = vmatprep.subr.bf16.mxu1 %v3607_v61  ;;  %3602 = vmatpush1.bf16.msra.mxu0 %v3601_v17 }
 0x175   : > { %3610 = vmatpush1.bf16.msra.mxu1 %v3609_v59 }
 0x177   : > { %3517 = vmatmul.mubr.msk.f32.vlgmr.msra.gmra.mrb[16].mxu0 %vm1843_vm1, %v4508_v60 }
 0x178   : > { %3521 = vmatmul.mubr.msk.f32.vlgmr.msra.gmra.mrb[16].mxu1 %vm1843_vm1, %v4508_v60  ;;  %1926 = vmatprep.mubr.f32.mxu0 %v3869_v0 }
 0x179   : > { %2015 = vmatprep.mubr.f32.mxu1 %v3869_v0 }
 0x17b   : > { %3518 = vmatmul.mubr.msk.f32.gmra.mrb[18].mxu0 %vm1843_vm1, %v4518_v7 }
 0x17c   : > { %3522 = vmatmul.mubr.msk.f32.gmra.mrb[18].mxu1 %vm1843_vm1, %v4518_v7  ;;  %1932 = vmatprep.mubr.f32.mxu0 %v3869_v0 }
 0x17d   : > { %2021 = vmatprep.mubr.f32.mxu1 %v3869_v0 }
 0x17f   : > { %3519 = vmatmul.mubr.msk.f32.gmra.mrb[20].mxu0 %vm1843_vm1, %v4529_v35 }
 0x180   : > { %3523 = vmatmul.mubr.msk.f32.gmra.mrb[20].mxu1 %vm1843_vm1, %v4529_v35  ;;  %1938 = vmatprep.mubr.f32.mxu0 %v3869_v0 }
 0x181   : > { %2027 = vmatprep.mubr.f32.mxu1 %v3869_v0 }
 0x183   : > { %3520 = vmatmul.mubr.msk.f32.gmra.mrb[22].mxu0 %vm1843_vm1, %v4540_v8 }
 0x184   : > { %3524 = vmatmul.mubr.msk.f32.gmra.mrb[22].mxu1 %vm1843_vm1, %v4540_v8  ;;  %2098 = vmatprep.mubr.f32.mxu0 %v3869_v0 }
 0x185   : > { %2187 = vmatprep.mubr.f32.mxu1 %v3869_v0 }
 0x191   : > { %v1695_v11 = vpop.f32.mrb[8].mxu0 }
 0x192   : > { %v1697_v12 = vpop.f32.mrb[9].mxu0  ;;  %v1811_v33 = vmax.f32 %v1695_v11, 0.0 }
 0x193   : > { %v1812_v13 = vmax.f32 %v1697_v12, 0.0 }
 0x195   : > { %v1701_v34 = vpop.f32.mrb[10].mxu0 }
 0x196   : > { %v1819_v5 = vmax.f32 %v1701_v34, 0.0  ;;  %v1703_v25 = vpop.f32.mrb[11].mxu0 }
 0x197   : > { %v1820_v37 = vmax.f32 %v1703_v25, 0.0 }
 0x198   : > { %v3613_v62 = vpack.c.bf16 %v1819_v5, %v1811_v33 }
 0x199   : > { %v3611_v23 = vpack.c.bf16 %v1820_v37, %v1812_v13  ;;  %v1707_v6 = vpop.f32.mrb[12].mxu0 }
 0x19a   : > { %v1709_v24 = vpop.f32.mrb[13].mxu0  ;;  %v1827_v47 = vmax.f32 %v1707_v6, 0.0 }
 0x19b   : > { %3612 = vmatprep.subr.bf16.mxu0 %v3611_v23  ;;  %v1828_v49 = vmax.f32 %v1709_v24, 0.0 }
 0x19c   : > { %3614 = vmatpush1.bf16.msra.mxu0 %v3613_v62 }
 0x19d   : > { %v1713_v27 = vpop.f32.mrb[14].mxu0 }
 0x19e   : > { %v1835_v10 = vmax.f32 %v1713_v27, 0.0  ;;  %v1715_v48 = vpop.f32.mrb[15].mxu0 }
 0x19f   : > { %v1836_v52 = vmax.f32 %v1715_v48, 0.0 }
 0x1a0   : > { %v3617_v42 = vpack.c.bf16 %v1835_v10, %v1827_v47 }
 0x1a1   : > { %v3615_v22 = vpack.c.bf16 %v1836_v52, %v1828_v49  ;;  %v4576_v52 = vld [vmem:[%s4833_s3] sm:$0xff] }
 0x1a3   : > { %3616 = vmatprep.subr.bf16.mxu0 %v3615_v22  ;;  %v4597_v22 = vld [vmem:[%s4833_s3 + $0x10] sm:$0xff] }
 0x1a4   : > { %3618 = vmatpush1.bf16.msra.mxu0 %v3617_v42  ;;  %v4586_v42 = vld [vmem:[%s4833_s3 + $0x8] sm:$0xff] }
 0x1a7   : > { %3525 = vmatmul.mubr.msk.f32.vlgmr.msra.gmra.mrb[24].mxu0 %vm1843_vm1, %v4508_v60 }
 0x1a8   : > { %2104 = vmatprep.mubr.f32.mxu0 %v3869_v0 }
 0x1ab   : > { %3526 = vmatmul.mubr.msk.f32.gmra.mrb[26].mxu0 %vm1843_vm1, %v4518_v7 }
 0x1ac   : > { %2110 = vmatprep.mubr.f32.mxu0 %v3869_v0 }
 0x1af   : > { %3527 = vmatmul.mubr.msk.f32.gmra.mrb[28].mxu0 %vm1843_vm1, %v4529_v35 }
 0x1b0   : > { %2116 = vmatprep.mubr.f32.mxu0 %v3869_v0 }
 0x1b1   : > { %v1784_v39 = vpop.f32.mrb[8].mxu1 }
 0x1b2   : > { %v1786_v58 = vpop.f32.mrb[9].mxu1  ;;  %v1813_v40 = vmax.f32 %v1784_v39, 0.0  ;;  %v4608_v39 = vld [vmem:[%s4833_s3 + $0x18] sm:$0xff] }
 0x1b3   : > { %3528 = vmatmul.mubr.msk.f32.gmra.mrb[30].mxu0 %vm1843_vm1, %v4540_v8  ;;  %v1814_v28 = vmax.f32 %v1786_v58, 0.0 }
 0x1b4   : > { %2324 = vmatprep.mubr.f32.mxu0 %v3869_v0 }
 0x1b5   : > { %v1790_v1 = vpop.f32.mrb[10].mxu1 }
 0x1b6   : > { %v1821_v14 = vmax.f32 %v1790_v1, 0.0  ;;  %v1792_v45 = vpop.f32.mrb[11].mxu1 }
 0x1b7   : > { %v1822_v16 = vmax.f32 %v1792_v45, 0.0 }
 0x1b8   : > { %v3621_v46 = vpack.c.bf16 %v1821_v14, %v1813_v40 }
 0x1b9   : > { %v3619_v31 = vpack.c.bf16 %v1822_v16, %v1814_v28  ;;  %v1796_v15 = vpop.f32.mrb[12].mxu1 }
 0x1ba   : > { %v1798_v2 = vpop.f32.mrb[13].mxu1  ;;  %v1829_v30 = vmax.f32 %v1796_v15, 0.0 }
 0x1bb   : > { %3620 = vmatprep.subr.bf16.mxu1 %v3619_v31  ;;  %v1830_v26 = vmax.f32 %v1798_v2, 0.0 }
 0x1bc   : > { %3622 = vmatpush1.bf16.msra.mxu1 %v3621_v46 }
 0x1bd   : > { %v1802_v63 = vpop.f32.mrb[14].mxu1 }
 0x1be   : > { %v1837_v51 = vmax.f32 %v1802_v63, 0.0  ;;  %v1804_v50 = vpop.f32.mrb[15].mxu1 }
 0x1bf   : > { %v1838_v3 = vmax.f32 %v1804_v50, 0.0 }
 0x1c0   : > { %v3625_v18 = vpack.c.bf16 %v1837_v51, %v1829_v30 }
 0x1c1   : > { %v3623_v19 = vpack.c.bf16 %v1838_v3, %v1830_v26 }
 0x1c3   : > { %3624 = vmatprep.subr.bf16.mxu1 %v3623_v19 }
 0x1c4   : > { %3626 = vmatpush1.bf16.msra.mxu1 %v3625_v18 }
 0x1c7   : > { %3529 = vmatmul.mubr.msk.f32.vlgmr.msra.gmra.mrb[24].mxu1 %vm1843_vm1, %v4508_v60 }
 0x1c8   : > { %2193 = vmatprep.mubr.f32.mxu1 %v3869_v0 }
 0x1cb   : > { %3530 = vmatmul.mubr.msk.f32.gmra.mrb[26].mxu1 %vm1843_vm1, %v4518_v7 }
 0x1cc   : > { %2199 = vmatprep.mubr.f32.mxu1 %v3869_v0 }
 0x1cf   : > { %3531 = vmatmul.mubr.msk.f32.gmra.mrb[28].mxu1 %vm1843_vm1, %v4529_v35 }
 0x1d0   : > { %2205 = vmatprep.mubr.f32.mxu1 %v3869_v0 }
 0x1d3   : > { %3532 = vmatmul.mubr.msk.f32.gmra.mrb[30].mxu1 %vm1843_vm1, %v4540_v8 }
 0x1d4   : > { %2413 = vmatprep.mubr.f32.mxu1 %v3869_v0 }
 0x24a   : > { %v1922_v4 = vpop.f32.mrb[16].mxu0 }
 0x24b   : > { %v2011_v29 = vpop.f32.mrb[16].mxu1  ;;  %v1924_v9 = vpop.f32.mrb[17].mxu0  ;;  %v2212_v20 = vmax.f32 %v1922_v4, 0.0 }
 0x24c   : > { %v2013_v41 = vpop.f32.mrb[17].mxu1  ;;  %v2214_v44 = vmax.f32 %v2011_v29, 0.0  ;;  %v2213_v53 = vmax.f32 %v1924_v9, 0.0 }
 0x24d   : > { %v2215_v17 = vmax.f32 %v2013_v41, 0.0 }
 0x24e   : > { %v1928_v43 = vpop.f32.mrb[18].mxu0 }
 0x24f   : > { %v2220_v38 = vmax.f32 %v1928_v43, 0.0  ;;  %v2017_v32 = vpop.f32.mrb[18].mxu1  ;;  %v1930_v36 = vpop.f32.mrb[19].mxu0 }
 0x250   : > { %v2222_v54 = vmax.f32 %v2017_v32, 0.0  ;;  %v2221_v55 = vmax.f32 %v1930_v36, 0.0  ;;  %v2019_v56 = vpop.f32.mrb[19].mxu1 }
 0x251   : > { %v3629_v57 = vpack.c.bf16 %v2220_v38, %v2212_v20  ;;  %v2223_v59 = vmax.f32 %v2019_v56, 0.0 }
 0x252   : > { %v3637_v21 = vpack.c.bf16 %v2222_v54, %v2214_v44  ;;  %v3627_v61 = vpack.c.bf16 %v2221_v55, %v2213_v53  ;;  %v1934_v60 = vpop.f32.mrb[20].mxu0 }
 0x253   : > { %v3635_v7 = vpack.c.bf16 %v2223_v59, %v2215_v17  ;;  %v2023_v35 = vpop.f32.mrb[20].mxu1  ;;  %v1936_v8 = vpop.f32.mrb[21].mxu0  ;;  %v2228_v34 = vmax.f32 %v1934_v60, 0.0 }
 0x254   : > { %v2025_v11 = vpop.f32.mrb[21].mxu1  ;;  %3628 = vmatprep.subr.bf16.mxu0 %v3627_v61  ;;  %v2230_v13 = vmax.f32 %v2023_v35, 0.0  ;;  %v2229_v37 = vmax.f32 %v1936_v8, 0.0 }
 0x255   : > { %3636 = vmatprep.subr.bf16.mxu1 %v3635_v7  ;;  %3630 = vmatpush1.bf16.msra.mxu0 %v3629_v57  ;;  %v2231_v24 = vmax.f32 %v2025_v11, 0.0 }
 0x256   : > { %3638 = vmatpush1.bf16.msra.mxu1 %v3637_v21  ;;  %v1940_v12 = vpop.f32.mrb[22].mxu0 }
 0x257   : > { %v2236_v33 = vmax.f32 %v1940_v12, 0.0  ;;  %v2029_v5 = vpop.f32.mrb[22].mxu1  ;;  %v1942_v25 = vpop.f32.mrb[23].mxu0 }
 0x258   : > { %v2238_v62 = vmax.f32 %v2029_v5, 0.0  ;;  %v2237_v23 = vmax.f32 %v1942_v25, 0.0  ;;  %v2031_v6 = vpop.f32.mrb[23].mxu1 }
 0x259   : > { %v3633_v27 = vpack.c.bf16 %v2236_v33, %v2228_v34  ;;  %v2239_v47 = vmax.f32 %v2031_v6, 0.0 }
 0x25a   : > { %v3641_v10 = vpack.c.bf16 %v2238_v62, %v2230_v13  ;;  %v3631_v48 = vpack.c.bf16 %v2237_v23, %v2229_v37 }
 0x25b   : > { %v3639_v49 = vpack.c.bf16 %v2239_v47, %v2231_v24 }
 0x25c   : > { %3632 = vmatprep.subr.bf16.mxu0 %v3631_v48 }
 0x25d   : > { %3640 = vmatprep.subr.bf16.mxu1 %v3639_v49  ;;  %3634 = vmatpush1.bf16.msra.mxu0 %v3633_v27 }
 0x25e   : > { %3642 = vmatpush1.bf16.msra.mxu1 %v3641_v10 }
 0x260   : > { %3533 = vmatmul.mubr.msk.f32.vlgmr.msra.gmra.mrb[32].mxu0 %vm1843_vm1, %v4576_v52 }
 0x261   : > { %3537 = vmatmul.mubr.msk.f32.vlgmr.msra.gmra.mrb[32].mxu1 %vm1843_vm1, %v4576_v52  ;;  %2330 = vmatprep.mubr.f32.mxu0 %v3869_v0 }
 0x262   : > { %2419 = vmatprep.mubr.f32.mxu1 %v3869_v0 }
 0x264   : > { %3534 = vmatmul.mubr.msk.f32.gmra.mrb[34].mxu0 %vm1843_vm1, %v4586_v42 }
 0x265   : > { %3538 = vmatmul.mubr.msk.f32.gmra.mrb[34].mxu1 %vm1843_vm1, %v4586_v42  ;;  %2336 = vmatprep.mubr.f32.mxu0 %v3869_v0 }
 0x266   : > { %2425 = vmatprep.mubr.f32.mxu1 %v3869_v0 }
 0x268   : > { %3535 = vmatmul.mubr.msk.f32.gmra.mrb[36].mxu0 %vm1843_vm1, %v4597_v22 }
 0x269   : > { %3539 = vmatmul.mubr.msk.f32.gmra.mrb[36].mxu1 %vm1843_vm1, %v4597_v22  ;;  %2342 = vmatprep.mubr.f32.mxu0 %v3869_v0 }
 0x26a   : > { %2431 = vmatprep.mubr.f32.mxu1 %v3869_v0 }
 0x26c   : > { %3536 = vmatmul.mubr.msk.f32.gmra.mrb[38].mxu0 %vm1843_vm1, %v4608_v39 }
 0x26d   : > { %3540 = vmatmul.mubr.msk.f32.gmra.mrb[38].mxu1 %vm1843_vm1, %v4608_v39  ;;  %2502 = vmatprep.mubr.f32.mxu0 %v3869_v0 }
 0x26e   : > { %2591 = vmatprep.mubr.f32.mxu1 %v3869_v0 }
 0x27a   : > { %v2100_v58 = vpop.f32.mrb[24].mxu0 }
 0x27b   : > { %v2102_v1 = vpop.f32.mrb[25].mxu0  ;;  %v2216_v14 = vmax.f32 %v2100_v58, 0.0 }
 0x27c   : > { %v2217_v16 = vmax.f32 %v2102_v1, 0.0 }
 0x27e   : > { %v2106_v40 = vpop.f32.mrb[26].mxu0 }
 0x27f   : > { %v2224_v45 = vmax.f32 %v2106_v40, 0.0  ;;  %v2108_v28 = vpop.f32.mrb[27].mxu0 }
 0x280   : > { %v2225_v46 = vmax.f32 %v2108_v28, 0.0 }
 0x281   : > { %v3645_v31 = vpack.c.bf16 %v2224_v45, %v2216_v14 }
 0x282   : > { %v3643_v15 = vpack.c.bf16 %v2225_v46, %v2217_v16  ;;  %v2112_v2 = vpop.f32.mrb[28].mxu0 }
 0x283   : > { %v2114_v63 = vpop.f32.mrb[29].mxu0  ;;  %v2232_v51 = vmax.f32 %v2112_v2, 0.0 }
 0x284   : > { %3644 = vmatprep.subr.bf16.mxu0 %v3643_v15  ;;  %v2233_v3 = vmax.f32 %v2114_v63, 0.0 }
 0x285   : > { %3646 = vmatpush1.bf16.msra.mxu0 %v3645_v31 }
 0x286   : > { %v2118_v30 = vpop.f32.mrb[30].mxu0 }
 0x287   : > { %v2240_v50 = vmax.f32 %v2118_v30, 0.0  ;;  %v2120_v26 = vpop.f32.mrb[31].mxu0 }
 0x288   : > { %v2241_v18 = vmax.f32 %v2120_v26, 0.0 }
 0x289   : > { %v3649_v19 = vpack.c.bf16 %v2240_v50, %v2232_v51 }
 0x28a   : > { %v3647_v4 = vpack.c.bf16 %v2241_v18, %v2233_v3 }
 0x28c   : > { %3648 = vmatprep.subr.bf16.mxu0 %v3647_v4 }
 0x28d   : > { %3650 = vmatpush1.bf16.msra.mxu0 %v3649_v19 }
 0x290   : > { %3541 = vmatmul.mubr.msk.f32.vlgmr.msra.gmra.mrb[40].mxu0 %vm1843_vm1, %v4576_v52 }
 0x291   : > { %2508 = vmatprep.mubr.f32.mxu0 %v3869_v0 }
 0x294   : > { %3542 = vmatmul.mubr.msk.f32.gmra.mrb[42].mxu0 %vm1843_vm1, %v4586_v42 }
 0x295   : > { %2514 = vmatprep.mubr.f32.mxu0 %v3869_v0 }
 0x298   : > { %3543 = vmatmul.mubr.msk.f32.gmra.mrb[44].mxu0 %vm1843_vm1, %v4597_v22 }
 0x299   : > { %2520 = vmatprep.mubr.f32.mxu0 %v3869_v0 }
 0x29a   : > { %v2189_v29 = vpop.f32.mrb[24].mxu1 }
 0x29b   : > { %v2191_v9 = vpop.f32.mrb[25].mxu1  ;;  %v2218_v43 = vmax.f32 %v2189_v29, 0.0 }
 0x29c   : > { %3544 = vmatmul.mubr.msk.f32.gmra.mrb[46].mxu0 %vm1843_vm1, %v4608_v39  ;;  %v2219_v32 = vmax.f32 %v2191_v9, 0.0 }
 0x29d   : > { %2748 = vmatprep.mubr.f32.mxu0 %v3869_v0 }
 0x29e   : > { %v2195_v41 = vpop.f32.mrb[26].mxu1 }
 0x29f   : > { %v2226_v20 = vmax.f32 %v2195_v41, 0.0  ;;  %v2197_v38 = vpop.f32.mrb[27].mxu1 }
 0x2a0   : > { %v2227_v36 = vmax.f32 %v2197_v38, 0.0 }
 0x2a1   : > { %v3653_v44 = vpack.c.bf16 %v2226_v20, %v2218_v43 }
 0x2a2   : > { %v3651_v53 = vpack.c.bf16 %v2227_v36, %v2219_v32  ;;  %v2201_v54 = vpop.f32.mrb[28].mxu1 }
 0x2a3   : > { %v2203_v55 = vpop.f32.mrb[29].mxu1  ;;  %v2234_v17 = vmax.f32 %v2201_v54, 0.0 }
 0x2a4   : > { %3652 = vmatprep.subr.bf16.mxu1 %v3651_v53  ;;  %v2235_v21 = vmax.f32 %v2203_v55, 0.0 }
 0x2a5   : > { %3654 = vmatpush1.bf16.msra.mxu1 %v3653_v44 }
 0x2a6   : > { %v2207_v56 = vpop.f32.mrb[30].mxu1 }
 0x2a7   : > { %v2242_v57 = vmax.f32 %v2207_v56, 0.0  ;;  %v2209_v59 = vpop.f32.mrb[31].mxu1 }
 0x2a8   : > { %v2243_v61 = vmax.f32 %v2209_v59, 0.0  ;;  %v4676_v59 = vld [vmem:[%s4835_s5 + $0x10] sm:$0xff] }
 0x2a9   : > { %v3657_v60 = vpack.c.bf16 %v2242_v57, %v2234_v17  ;;  %v4660_v17 = vld [vmem:[%s4835_s5] sm:$0xff]  ;;  %v4668_v57 = vld [vmem:[%s4835_s5 + $0x8] sm:$0xff] }
 0x2aa   : > { %v3655_v7 = vpack.c.bf16 %v2243_v61, %v2235_v21  ;;  %v4684_v61 = vld [vmem:[%s4835_s5 + $0x18] sm:$0xff] }
 0x2ac   : > { %3656 = vmatprep.subr.bf16.mxu1 %v3655_v7 }
 0x2ad   : > { %3658 = vmatpush1.bf16.msra.mxu1 %v3657_v60 }
 0x2b0   : > { %3545 = vmatmul.mubr.msk.f32.vlgmr.msra.gmra.mrb[40].mxu1 %vm1843_vm1, %v4576_v52 }
 0x2b1   : > { %2597 = vmatprep.mubr.f32.mxu1 %v3869_v0 }
 0x2b4   : > { %3546 = vmatmul.mubr.msk.f32.gmra.mrb[42].mxu1 %vm1843_vm1, %v4586_v42 }
 0x2b5   : > { %2603 = vmatprep.mubr.f32.mxu1 %v3869_v0 }
 0x2b8   : > { %3547 = vmatmul.mubr.msk.f32.gmra.mrb[44].mxu1 %vm1843_vm1, %v4597_v22 }
 0x2b9   : > { %2609 = vmatprep.mubr.f32.mxu1 %v3869_v0 }
 0x2bc   : > { %3548 = vmatmul.mubr.msk.f32.gmra.mrb[46].mxu1 %vm1843_vm1, %v4608_v39 }
 0x2bd   : > { %2837 = vmatprep.mubr.f32.mxu1 %v3869_v0 }
 0x333   : > { %v2326_v35 = vpop.f32.mrb[32].mxu0 }
 0x334   : > { %v4641_v8 = vpop.f32.mrb[32].mxu1  ;;  %v2328_v11 = vpop.f32.mrb[33].mxu0 }
 0x335   : > { %v4643_v12 = vpop.f32.mrb[33].mxu1 }
 0x337   : > { %v2332_v34 = vpop.f32.mrb[34].mxu0 }
 0x338   : > { %v4645_v33 = vpop.f32.mrb[34].mxu1  ;;  %v2334_v5 = vpop.f32.mrb[35].mxu0 }
 0x339   : > { %v4647_v25 = vpop.f32.mrb[35].mxu1 }
 0x33b   : > { %v2338_v13 = vpop.f32.mrb[36].mxu0 }
 0x33c   : > { %v4649_v37 = vpop.f32.mrb[36].mxu1  ;;  %v2340_v62 = vpop.f32.mrb[37].mxu0 }
 0x33d   : > { %v4651_v23 = vpop.f32.mrb[37].mxu1 }
 0x33f   : > { %v2344_v6 = vpop.f32.mrb[38].mxu0 }
 0x340   : > { %v4653_v24 = vpop.f32.mrb[38].mxu1  ;;  %v2346_v27 = vpop.f32.mrb[39].mxu0 }
 0x341   : > { %v4655_v47 = vpop.f32.mrb[39].mxu1 }
 0x363   : > { %v2504_v10 = vpop.f32.mrb[40].mxu0 }
 0x364   : > { %v2616_v48 = vadd.f32 %v2504_v10, %v2326_v35  ;;  %v2636_v49 = vsub.f32 %v2326_v35, %v2504_v10  ;;  %v2506_v52 = vpop.f32.mrb[41].mxu0 }
 0x365   : > { %v2617_v42 = vadd.f32 %v2506_v52, %v2328_v11  ;;  %v2637_v22 = vsub.f32 %v2328_v11, %v2506_v52 }
 0x366   : > { %v2652_v28 = vand.u32 2147483647, %v2636_v49 }
 0x367   : > { %v2510_v39 = vpop.f32.mrb[42].mxu0  ;;  %v2653_v31 = vand.u32 2147483647, %v2637_v22 }
 0x368   : > { %v2620_v58 = vadd.f32 %v2510_v39, %v2332_v34  ;;  %v2640_v1 = vsub.f32 %v2332_v34, %v2510_v39  ;;  %v2512_v40 = vpop.f32.mrb[43].mxu0 }
 0x369   : > { %v2621_v14 = vadd.f32 %v2512_v40, %v2334_v5  ;;  %v2641_v45 = vsub.f32 %v2334_v5, %v2512_v40 }
 0x36a   : > { %v2656_v16 = vand.u32 2147483647, %v2640_v1  ;;  %v3677_v46 = vpack.c.bf16 %v2620_v58, %v2616_v48 }
 0x36b   : > { %v2657_v15 = vand.u32 2147483647, %v2641_v45  ;;  %v3675_v2 = vpack.c.bf16 %v2621_v14, %v2617_v42  ;;  %v2516_v63 = vpop.f32.mrb[44].mxu0 }
 0x36c   : > { %v3661_v30 = vpack.c.bf16 %v2656_v16, %v2652_v28  ;;  %v2624_v51 = vadd.f32 %v2516_v63, %v2338_v13  ;;  %v2644_v50 = vsub.f32 %v2338_v13, %v2516_v63  ;;  %v2518_v26 = vpop.f32.mrb[45].mxu0  ;;  %v2632_v13 = vld [vmem:[%s4834_s4] sm:$0xff] }
 0x36d   : > { %v2625_v3 = vadd.f32 %v2518_v26, %v2340_v62  ;;  %v2645_v18 = vsub.f32 %v2340_v62, %v2518_v26  ;;  %v3659_v19 = vpack.c.bf16 %v2657_v15, %v2653_v31 }
 0x36e   : > { %v2660_v38 = vand.u32 2147483647, %v2644_v50 }
 0x36f   : > { %v2522_v4 = vpop.f32.mrb[46].mxu0  ;;  %3660 = vmatprep.subr.bf16.mxu0 %v3659_v19  ;;  %v2661_v44 = vand.u32 2147483647, %v2645_v18 }
 0x370   : > { %v2628_v29 = vadd.f32 %v2522_v4, %v2344_v6  ;;  %v2648_v9 = vsub.f32 %v2344_v6, %v2522_v4  ;;  %v2524_v41 = vpop.f32.mrb[47].mxu0  ;;  %3662 = vmatpush1.bf16.msra.mxu0 %v3661_v30  ;;  %v3280_v4 = vld [vmem:[%s4837_s7 + $0x10] sm:$0xff] }
 0x371   : > { %v2629_v43 = vadd.f32 %v2524_v41, %v2346_v27  ;;  %v2649_v20 = vsub.f32 %v2346_v27, %v2524_v41  ;;  %v3281_v41 = vld [vmem:[%s4837_s7 + $0x18] sm:$0xff] }
 0x372   : > { %v2664_v32 = vand.u32 2147483647, %v2648_v9  ;;  %v3681_v36 = vpack.c.bf16 %v2628_v29, %v2624_v51  ;;  %v3876_v29 = vmov 0   ;;  %v3279_v9 = vld [vmem:[%s4837_s7 + $0x8] sm:$0xff] }
 0x373   : > { %v2665_v53 = vand.u32 2147483647, %v2649_v20  ;;  %v3679_v54 = vpack.c.bf16 %v2629_v43, %v2625_v3  ;;  %3787 = vset.pattern.permute.xlu0 %v3876_v29  ;;  %3788 = vset.pattern.permute.xlu1 %v3876_v29 }
 0x374   : > { %v3665_v55 = vpack.c.bf16 %v2664_v32, %v2660_v38  ;;  %3294 = vperm.xlu1 %3788, %v3280_v4  }
 0x375   : > { %v3663_v56 = vpack.c.bf16 %v2665_v53, %v2661_v44 }
 0x377   : > { %3664 = vmatprep.subr.bf16.mxu0 %v3663_v56 }
 0x378   : > { %3666 = vmatpush1.bf16.msra.mxu0 %v3665_v55  ;;  %3299 = vperm.xlu1 %3788, %v3281_v41  }
 0x379   : > { %3676 = vmatprep.subr.bf16.mxu0 %v3675_v2 }
 0x37b   : > { %3549 = vmatmul.mubr.msk.f32.vlgmr.msra.gmra.mrb[48].mxu0 %vm1843_vm1, %v4660_v17 }
 0x37c   : > { %3678 = vmatpush1.bf16.msra.mxu0 %v3677_v46  ;;  %2754 = vmatprep.mubr.f32.mxu0 %v3869_v0  ;;  %v2634_v46 = vld [vmem:[%s4834_s4 + $0x10] sm:$0xff] }
 0x37d   : > { %3680 = vmatprep.subr.bf16.mxu0 %v3679_v54 }
 0x37f   : > { %3550 = vmatmul.mubr.msk.f32.gmra.mrb[50].mxu0 %vm1843_vm1, %v4668_v57 }
 0x380   : > { %3682 = vmatpush1.bf16.msra.mxu0 %v3681_v36  ;;  %2760 = vmatprep.mubr.f32.mxu0 %v3869_v0 }
 0x383   : > { %3551 = vmatmul.mubr.msk.f32.gmra.mrb[52].mxu0 %vm1843_vm1, %v4676_v59  ;;  %v2593_v21 = vpop.f32.mrb[40].mxu1 }
 0x384   : > { %2766 = vmatprep.mubr.f32.mxu0 %v3869_v0  ;;  %v2618_v60 = vadd.f32 %v2593_v21, %v4641_v8  ;;  %v2638_v7 = vsub.f32 %v4641_v8, %v2593_v21  ;;  %v2595_v35 = vpop.f32.mrb[41].mxu1 }
 0x385   : > { %v2619_v11 = vadd.f32 %v2595_v35, %v4643_v12  ;;  %v2639_v34 = vsub.f32 %v4643_v12, %v2595_v35 }
 0x386   : > { %v2654_v12 = vand.u32 2147483647, %v2638_v7 }
 0x387   : > { %3552 = vmatmul.mubr.msk.f32.gmra.mrb[54].mxu0 %vm1843_vm1, %v4684_v61  ;;  %v2599_v5 = vpop.f32.mrb[42].mxu1  ;;  %v2655_v52 = vand.u32 2147483647, %v2639_v34 }
 0x388   : > { %2938 = vmatprep.mubr.f32.mxu0 %v3869_v0  ;;  %v2622_v62 = vadd.f32 %v2599_v5, %v4645_v33  ;;  %v2642_v6 = vsub.f32 %v4645_v33, %v2599_v5  ;;  %v2601_v8 = vpop.f32.mrb[43].mxu1  ;;  %v2633_v33 = vld [vmem:[%s4834_s4 + $0x8] sm:$0xff]  ;;  %v3068_v5 = vld [vmem:[%s4836_s6] sm:$0xff] }
 0x389   : > { %v2623_v27 = vadd.f32 %v2601_v8, %v4647_v25  ;;  %v2643_v10 = vsub.f32 %v4647_v25, %v2601_v8 }
 0x38a   : > { %v2658_v48 = vand.u32 2147483647, %v2642_v6  ;;  %v3685_v49 = vpack.c.bf16 %v2622_v62, %v2618_v60  ;;  %v3070_v62 = vld [vmem:[%s4836_s6 + $0x10] sm:$0xff]  ;;  %v3071_v6 = vld [vmem:[%s4836_s6 + $0x18] sm:$0xff] }
 0x38b   : > { %3557 = vmatmul.mubr.msk.f32.vlgmr.msra.gmra.mrb[48].mxu0 %vm1843_vm1, %v2632_v13  ;;  %v2659_v42 = vand.u32 2147483647, %v2643_v10  ;;  %v3683_v22 = vpack.c.bf16 %v2623_v27, %v2619_v11  ;;  %v2605_v39 = vpop.f32.mrb[44].mxu1 }
 0x38c   : > { %2944 = vmatprep.mubr.f32.mxu0 %v3869_v0  ;;  %v3669_v58 = vpack.c.bf16 %v2658_v48, %v2654_v12  ;;  %v2626_v1 = vadd.f32 %v2605_v39, %v4649_v37  ;;  %v2646_v25 = vsub.f32 %v4649_v37, %v2605_v39  ;;  %v2607_v40 = vpop.f32.mrb[45].mxu1 }
 0x38d   : > { %v2627_v14 = vadd.f32 %v2607_v40, %v4651_v23  ;;  %v2647_v45 = vsub.f32 %v4651_v23, %v2607_v40  ;;  %v3667_v28 = vpack.c.bf16 %v2659_v42, %v2655_v52 }
 0x38e   : > { %v2662_v63 = vand.u32 2147483647, %v2646_v25 }
 0x38f   : > { %3558 = vmatmul.mubr.msk.f32.gmra.mrb[50].mxu0 %vm1843_vm1, %v2633_v33  ;;  %v2611_v16 = vpop.f32.mrb[46].mxu1  ;;  %3668 = vmatprep.subr.bf16.mxu1 %v3667_v28  ;;  %v2663_v50 = vand.u32 2147483647, %v2647_v45 }
 0x390   : > { %2950 = vmatprep.mubr.f32.mxu0 %v3869_v0  ;;  %v2630_v31 = vadd.f32 %v2611_v16, %v4653_v24  ;;  %v2650_v37 = vsub.f32 %v4653_v24, %v2611_v16  ;;  %v2613_v15 = vpop.f32.mrb[47].mxu1  ;;  %3670 = vmatpush1.bf16.msra.mxu1 %v3669_v58  ;;  %v2635_v24 = vld [vmem:[%s4834_s4 + $0x18] sm:$0xff] }
 0x391   : > { %v2631_v2 = vadd.f32 %v2613_v15, %v4655_v47  ;;  %v2651_v23 = vsub.f32 %v4655_v47, %v2613_v15  ;;  %v3278_v47 = vld [vmem:[%s4837_s7] sm:$0xff] }
 0x392   : > { %v2666_v30 = vand.u32 2147483647, %v2650_v37  ;;  %v3689_v51 = vpack.c.bf16 %v2630_v31, %v2626_v1  ;;  %3284 = vperm.xlu0 %3787, %v3278_v47  }
 0x393   : > { %3559 = vmatmul.mubr.msk.f32.gmra.mrb[52].mxu0 %vm1843_vm1, %v2634_v46  ;;  %v2667_v26 = vand.u32 2147483647, %v2651_v23  ;;  %v3687_v3 = vpack.c.bf16 %v2631_v2, %v2627_v14 }
 0x394   : > { %2956 = vmatprep.mubr.f32.mxu0 %v3869_v0  ;;  %v3673_v18 = vpack.c.bf16 %v2666_v30, %v2662_v63 }
 0x395   : > { %v3671_v19 = vpack.c.bf16 %v2667_v26, %v2663_v50 }
 0x396   : > { %3289 = vperm.xlu0 %3787, %v3279_v9  }
 0x397   : > { %3560 = vmatmul.mubr.msk.f32.gmra.mrb[54].mxu0 %vm1843_vm1, %v2635_v24  ;;  %3672 = vmatprep.subr.bf16.mxu1 %v3671_v19 }
 0x398   : > { %3148 = vmatprep.mubr.f32.mxu0 %v3869_v0  ;;  %3674 = vmatpush1.bf16.msra.mxu1 %v3673_v18 }
 0x399   : > { %3684 = vmatprep.subr.bf16.mxu1 %v3683_v22 }
 0x39b   : > { %3553 = vmatmul.mubr.msk.f32.vlgmr.msra.gmra.mrb[48].mxu1 %vm1843_vm1, %v4660_v17 }
 0x39c   : > { %3686 = vmatpush1.bf16.msra.mxu1 %v3685_v49  ;;  %2843 = vmatprep.mubr.f32.mxu1 %v3869_v0 }
 0x39d   : > { %3688 = vmatprep.subr.bf16.mxu1 %v3687_v3 }
 0x39f   : > { %3554 = vmatmul.mubr.msk.f32.gmra.mrb[50].mxu1 %vm1843_vm1, %v4668_v57 }
 0x3a0   : > { %3690 = vmatpush1.bf16.msra.mxu1 %v3689_v51  ;;  %2849 = vmatprep.mubr.f32.mxu1 %v3869_v0 }
 0x3a3   : > { %3555 = vmatmul.mubr.msk.f32.gmra.mrb[52].mxu1 %vm1843_vm1, %v4676_v59 }
 0x3a4   : > { %2855 = vmatprep.mubr.f32.mxu1 %v3869_v0 }
 0x3a7   : > { %3556 = vmatmul.mubr.msk.f32.gmra.mrb[54].mxu1 %vm1843_vm1, %v4684_v61 }
 0x3a8   : > { %3027 = vmatprep.mubr.f32.mxu1 %v3869_v0 }
 0x3ab   : > { %3561 = vmatmul.mubr.msk.f32.vlgmr.msra.gmra.mrb[48].mxu1 %vm1843_vm1, %v2632_v13  ;;  %v3069_v13 = vld [vmem:[%s4836_s6 + $0x8] sm:$0xff] }
 0x3ac   : > { %3033 = vmatprep.mubr.f32.mxu1 %v3869_v0 }
 0x3af   : > { %3562 = vmatmul.mubr.msk.f32.gmra.mrb[50].mxu1 %vm1843_vm1, %v2633_v33 }
 0x3b0   : > { %3039 = vmatprep.mubr.f32.mxu1 %v3869_v0 }
 0x3b3   : > { %3563 = vmatmul.mubr.msk.f32.gmra.mrb[52].mxu1 %vm1843_vm1, %v2634_v46 }
 0x3b4   : > { %3045 = vmatprep.mubr.f32.mxu1 %v3869_v0 }
 0x3b7   : > { %3564 = vmatmul.mubr.msk.f32.gmra.mrb[54].mxu1 %vm1843_vm1, %v2635_v24 }
 0x3b8   : > { %3237 = vmatprep.mubr.f32.mxu1 %v3869_v0 }
 0x3f3   : > { %v3295_v4 = vpop.permute.xlu1 %3294 }
 0x411   : > { %v3285_v31 = vpop.permute.xlu0 %3284 }
 0x415   : > { %v3290_v30 = vpop.permute.xlu0 %3289 }
 0x45e   : > { %v2940_v43 = vpop.f32.mrb[48].mxu0 }
 0x45f   : > { %v2942_v20 = vpop.f32.mrb[49].mxu0  ;;  %v3052_v32 = vmax.f32 %v2940_v43, 0.0 }
 0x460   : > { %v3053_v53 = vmax.f32 %v2942_v20, 0.0 }
 0x462   : > { %v2946_v38 = vpop.f32.mrb[50].mxu0 }
 0x463   : > { %v3056_v36 = vmax.f32 %v2946_v38, 0.0  ;;  %v2948_v44 = vpop.f32.mrb[51].mxu0 }
 0x464   : > { %v3057_v54 = vmax.f32 %v2948_v44, 0.0 }
 0x465   : > { %v3693_v55 = vpack.c.bf16 %v3056_v36, %v3052_v32 }
 0x466   : > { %v3691_v56 = vpack.c.bf16 %v3057_v54, %v3053_v53  ;;  %v2952_v17 = vpop.f32.mrb[52].mxu0 }
 0x467   : > { %v2954_v57 = vpop.f32.mrb[53].mxu0  ;;  %v3060_v21 = vmax.f32 %v2952_v17, 0.0 }
 0x468   : > { %3692 = vmatprep.subr.bf16.mxu0 %v3691_v56  ;;  %v3061_v7 = vmax.f32 %v2954_v57, 0.0 }
 0x469   : > { %3694 = vmatpush1.bf16.msra.mxu0 %v3693_v55  ;;  %v3300_v55 = vpop.permute.xlu1 %3299 }
 0x46a   : > { %v2958_v59 = vpop.f32.mrb[54].mxu0 }
 0x46b   : > { %v3064_v61 = vmax.f32 %v2958_v59, 0.0  ;;  %v2960_v60 = vpop.f32.mrb[55].mxu0 }
 0x46c   : > { %v3065_v35 = vmax.f32 %v2960_v60, 0.0 }
 0x46d   : > { %v3697_v11 = vpack.c.bf16 %v3064_v61, %v3060_v21 }
 0x46e   : > { %v3695_v34 = vpack.c.bf16 %v3065_v35, %v3061_v7 }
 0x470   : > { %3696 = vmatprep.subr.bf16.mxu0 %v3695_v34 }
 0x471   : > { %3698 = vmatpush1.bf16.msra.mxu0 %v3697_v11 }
 0x474   : > { %3565 = vmatmul.mubr.msk.f32.vlgmr.msra.gmra.mrb[56].mxu0 %vm1843_vm1, %v3068_v5 }
 0x475   : > { %3154 = vmatprep.mubr.f32.mxu0 %v3869_v0 }
 0x478   : > { %3566 = vmatmul.mubr.msk.f32.gmra.mrb[58].mxu0 %vm1843_vm1, %v3069_v13 }
 0x479   : > { %3160 = vmatprep.mubr.f32.mxu0 %v3869_v0 }
 0x47c   : > { %3567 = vmatmul.mubr.msk.f32.gmra.mrb[60].mxu0 %vm1843_vm1, %v3070_v62 }
 0x47d   : > { %3166 = vmatprep.mubr.f32.mxu0 %v3869_v0 }
 0x47e   : > { %v3029_v8 = vpop.f32.mrb[48].mxu1 }
 0x47f   : > { %v3031_v27 = vpop.f32.mrb[49].mxu1  ;;  %v3054_v12 = vmax.f32 %v3029_v8, 0.0 }
 0x480   : > { %3568 = vmatmul.mubr.msk.f32.gmra.mrb[62].mxu0 %vm1843_vm1, %v3071_v6  ;;  %v3055_v52 = vmax.f32 %v3031_v27, 0.0 }
 0x482   : > { %v3035_v10 = vpop.f32.mrb[50].mxu1 }
 0x483   : > { %v3058_v48 = vmax.f32 %v3035_v10, 0.0  ;;  %v3037_v49 = vpop.f32.mrb[51].mxu1 }
 0x484   : > { %v3059_v42 = vmax.f32 %v3037_v49, 0.0 }
 0x485   : > { %v3701_v22 = vpack.c.bf16 %v3058_v48, %v3054_v12 }
 0x486   : > { %v3699_v39 = vpack.c.bf16 %v3059_v42, %v3055_v52  ;;  %v3041_v33 = vpop.f32.mrb[52].mxu1 }
 0x487   : > { %v3043_v58 = vpop.f32.mrb[53].mxu1  ;;  %v3062_v25 = vmax.f32 %v3041_v33, 0.0 }
 0x488   : > { %3700 = vmatprep.subr.bf16.mxu1 %v3699_v39  ;;  %v3063_v45 = vmax.f32 %v3043_v58, 0.0 }
 0x489   : > { %3702 = vmatpush1.bf16.msra.mxu1 %v3701_v22 }
 0x48a   : > { %v3047_v1 = vpop.f32.mrb[54].mxu1 }
 0x48b   : > { %v3066_v40 = vmax.f32 %v3047_v1, 0.0  ;;  %v3049_v14 = vpop.f32.mrb[55].mxu1 }
 0x48c   : > { %v3067_v28 = vmax.f32 %v3049_v14, 0.0 }
 0x48d   : > { %v3705_v16 = vpack.c.bf16 %v3066_v40, %v3062_v25 }
 0x48e   : > { %v3703_v46 = vpack.c.bf16 %v3067_v28, %v3063_v45 }
 0x490   : > { %3704 = vmatprep.subr.bf16.mxu1 %v3703_v46 }
 0x491   : > { %3706 = vmatpush1.bf16.msra.mxu1 %v3705_v16 }
 0x494   : > { %3569 = vmatmul.mubr.msk.f32.vlgmr.msra.gmra.mrb[56].mxu1 %vm1843_vm1, %v3068_v5 }
 0x495   : > { %3243 = vmatprep.mubr.f32.mxu1 %v3869_v0 }
 0x498   : > { %3570 = vmatmul.mubr.msk.f32.gmra.mrb[58].mxu1 %vm1843_vm1, %v3069_v13 }
 0x499   : > { %3249 = vmatprep.mubr.f32.mxu1 %v3869_v0 }
 0x49c   : > { %3571 = vmatmul.mubr.msk.f32.gmra.mrb[60].mxu1 %vm1843_vm1, %v3070_v62 }
 0x49d   : > { %3255 = vmatprep.mubr.f32.mxu1 %v3869_v0 }
 0x4a0   : > { %3572 = vmatmul.mubr.msk.f32.gmra.mrb[62].mxu1 %vm1843_vm1, %v3071_v6 }
 0x547   : > { %v3150_v37 = vpop.f32.mrb[56].mxu0 }
 0x548   : > { %v3152_v15 = vpop.f32.mrb[57].mxu0  ;;  %v3262_v2 = vmax.f32 %v3150_v37, 0.0 }
 0x549   : > { %v3263_v23 = vmax.f32 %v3152_v15, 0.0 }
 0x54a   : > { %v3302_v3 = vmul.f32 %v3285_v31, %v3262_v2 }
 0x54b   : > { %v3156_v63 = vpop.f32.mrb[58].mxu0  ;;  %v3303_v18 = vmul.f32 %v3285_v31, %v3263_v23 }
 0x54c   : > { %v3266_v51 = vmax.f32 %v3156_v63, 0.0  ;;  %v3158_v50 = vpop.f32.mrb[59].mxu0 }
 0x54d   : > { %v3267_v26 = vmax.f32 %v3158_v50, 0.0 }
 0x54e   : > { %v3306_v24 = vmul.f32 %v3290_v30, %v3266_v51 }
 0x54f   : > { %v3307_v19 = vmul.f32 %v3290_v30, %v3267_v26  ;;  %v3162_v47 = vpop.f32.mrb[60].mxu0 }
 0x550   : > { %v3318_v29 = vadd.f32 %v3306_v24, %v3302_v3  ;;  %v3270_v0 = vmax.f32 %v3162_v47, 0.0  ;;  %v3164_v9 = vpop.f32.mrb[61].mxu0 }
 0x551   : > { %v3327_v41 = vadd.f32 %v3307_v19, %v3303_v18  ;;  %v3271_v43 = vmax.f32 %v3164_v9, 0.0  ;;  %v3363_v9 = vlaneseq }
 0x552   : > { %v3310_v20 = vmul.f32 %v3295_v4, %v3270_v0 }
 0x553   : > { %v3311_v38 = vmul.f32 %v3295_v4, %v3271_v43  ;;  %v3168_v32 = vpop.f32.mrb[62].mxu0  ;;  %vm3385_vm8 = vcmp.lt.s32.totalorder %v3363_v9, 512 }
 0x554   : > { %v3274_v36 = vmax.f32 %v3168_v32, 0.0  ;;  %v3170_v44 = vpop.f32.mrb[63].mxu0  ;;  %v3319_v53 = vadd.f32 %v3318_v29, %v3310_v20  ;;  %v3877_v29 = vmov 1966171168   ;;  %v3364_v32 = vshrl.u32 %v3363_v9, 7 }
 0x555   : > { %v3275_v54 = vmax.f32 %v3170_v44, 0.0  ;;  %v3328_v56 = vadd.f32 %v3327_v41, %v3311_v38  ;;  %v3361_v0 = vunpack.c.l.s4 %v3877_v29 }
 0x556   : > { %v3314_v17 = vmul.f32 %v3300_v55, %v3274_v36 }
 0x557   : > { %v3315_v57 = vmul.f32 %v3300_v55, %v3275_v54  ;;  %v3362_v38 = vunpack.c.0.s8 %v3361_v0 }
 0x558   : > { %v3320_v59 = vadd.f32 %v3319_v53, %v3314_v17 }
 0x559   : > { %v3329_v21 = vadd.f32 %v3328_v56, %v3315_v57 }
 0x55a   : > { %v3321_v61 = vrot.slane %v3320_v59, 4 }
 0x55b   : > { %v3330_v60 = vrot.slane %v3329_v21, 4 }
 0x55c   : > { %v3322_v7 = vadd.f32 %v3321_v61, %v3320_v59 }
 0x55d   : > { %v3331_v35 = vadd.f32 %v3330_v60, %v3329_v21 }
 0x55e   : > { %v3323_v11 = vrot.slane %v3322_v7, 2 }
 0x55f   : > { %v3332_v34 = vrot.slane %v3331_v35, 2 }
 0x560   : > { %v3324_v5 = vadd.f32 %v3323_v11, %v3322_v7 }
 0x561   : > { %v3333_v13 = vadd.f32 %v3332_v34, %v3331_v35 }
 0x562   : > { %v3325_v62 = vrot.slane %v3324_v5, 1 }
 0x563   : > { %v3334_v6 = vrot.slane %v3333_v13, 1 }
 0x564   : > { %v3326_v8 = vadd.f32 %v3325_v62, %v3324_v5 }
 0x565   : > { %v3335_v27 = vadd.f32 %v3334_v6, %v3333_v13 }
 0x567   : > { %v3358_v10 = vcombine.low %v3326_v8, %v3335_v27  ;;  %v3239_v12 = vpop.f32.mrb[56].mxu1 }
 0x568   : > { %v3241_v48 = vpop.f32.mrb[57].mxu1  ;;  %v3264_v49 = vmax.f32 %v3239_v12, 0.0 }
 0x569   : > { %v3265_v52 = vmax.f32 %v3241_v48, 0.0 }
 0x56a   : > { %v3304_v58 = vmul.f32 %v3285_v31, %v3264_v49 }
 0x56b   : > { %v3245_v42 = vpop.f32.mrb[58].mxu1  ;;  %v3305_v25 = vmul.f32 %v3285_v31, %v3265_v52 }
 0x56c   : > { %v3268_v22 = vmax.f32 %v3245_v42, 0.0  ;;  %v3247_v39 = vpop.f32.mrb[59].mxu1 }
 0x56d   : > { %v3269_v33 = vmax.f32 %v3247_v39, 0.0 }
 0x56e   : > { %v3308_v1 = vmul.f32 %v3290_v30, %v3268_v22 }
 0x56f   : > { %v3309_v40 = vmul.f32 %v3290_v30, %v3269_v33  ;;  %v3251_v14 = vpop.f32.mrb[60].mxu1 }
 0x570   : > { %v3336_v45 = vadd.f32 %v3308_v1, %v3304_v58  ;;  %v3272_v28 = vmax.f32 %v3251_v14, 0.0  ;;  %v3253_v16 = vpop.f32.mrb[61].mxu1 }
 0x571   : > { %v3345_v46 = vadd.f32 %v3309_v40, %v3305_v25  ;;  %v3273_v37 = vmax.f32 %v3253_v16, 0.0 }
 0x572   : > { %v3312_v15 = vmul.f32 %v3295_v4, %v3272_v28 }
 0x573   : > { %v3313_v2 = vmul.f32 %v3295_v4, %v3273_v37  ;;  %v3257_v23 = vpop.f32.mrb[62].mxu1 }
 0x574   : > { %v3276_v63 = vmax.f32 %v3257_v23, 0.0  ;;  %v3259_v51 = vpop.f32.mrb[63].mxu1  ;;  %v3337_v50 = vadd.f32 %v3336_v45, %v3312_v15 }
 0x575   : > { %v3277_v26 = vmax.f32 %v3259_v51, 0.0  ;;  %v3346_v3 = vadd.f32 %v3345_v46, %v3313_v2 }
 0x576   : > { %v3316_v24 = vmul.f32 %v3300_v55, %v3276_v63 }
 0x577   : > { %v3317_v18 = vmul.f32 %v3300_v55, %v3277_v26  ;;  %v3365_v55 = vsub.s32 %v3362_v38, %v3364_v32 }
 0x578   : > { %v3338_v19 = vadd.f32 %v3337_v50, %v3316_v24 }
 0x579   : > { %v3347_v31 = vadd.f32 %v3346_v3, %v3317_v18  ;;  %v3366_v59 = vrot.slane %v3358_v10, %v3365_v55 }
 0x57a   : > { %v3339_v30 = vrot.slane %v3338_v19, 4 }
 0x57b   : > { %v3348_v47 = vrot.slane %v3347_v31, 4 }
 0x57c   : > { %v3340_v41 = vadd.f32 %v3339_v30, %v3338_v19 }
 0x57d   : > { %v3349_v43 = vadd.f32 %v3348_v47, %v3347_v31 }
 0x57e   : > { %v3341_v20 = vrot.slane %v3340_v41, 2 }
 0x57f   : > { %v3350_v4 = vrot.slane %v3349_v43, 2 }
 0x580   : > { %v3342_v36 = vadd.f32 %v3341_v20, %v3340_v41 }
 0x581   : > { %v3351_v44 = vadd.f32 %v3350_v4, %v3349_v43 }
 0x582   : > { %v3343_v53 = vrot.slane %v3342_v36, 1 }
 0x583   : > { %v3352_v54 = vrot.slane %v3351_v44, 1 }
 0x584   : > { %v3344_v56 = vadd.f32 %v3343_v53, %v3342_v36 }
 0x585   : > { %v3353_v17 = vadd.f32 %v3352_v54, %v3351_v44 }
 0x587   : > { %v3359_v57 = vcombine.low %v3344_v56, %v3353_v17 }
 0x589   : > { %v3373_v21 = vrot.slane %v3359_v57, %v3365_v55 }
 0x58b   : > { %v3374_v61 = vcombine.low %v3366_v59, %v3373_v21 }
 0x58d   : > { %v3381_v60 = vrot.slane %v3374_v61, %v3365_v55 }
 0x58f   : > { %3387 = vst.msk [vmem:[%s299_s13] sm:$0xf] %vm3385_vm8, %v3381_v60 }
 0x590   : > { %3818 = shalt.err (!%p3815_p3)
}
 0x591   : > { %s3819_s25 = scalar_lea.hbm %s4788_s20, 64  ;;  %s3823_s12 = scalar_lea.hbm %s4838_s8, 128 }
 0x592   : > { %p3820_p4 = scmp.ne.s32.totalorder %s4788_s20, %s3819_s25  ;;  %p3824_p9 = scmp.lt.u32.totalorder %s4788_s20, %s4838_s8 }
 0x593   : > { %p3825_p10 = scmp.lt.u32.totalorder %s3823_s12, %s3819_s25  ;;  %p3827_p12 = scmp.lt.u32.totalorder %s3819_s25, %s4788_s20 }
 0x594   : > { %p3821_p7 = pnand %p3820_p4, %p3962_p5 }
 0x595   : > { %p3826_p11 = por %p3825_p10, %p3824_p9 }
 0x596   : > { %p3822_p8 = pneg %p3821_p7 }
 0x597   : > { %p3828_p13 = por %p3827_p12, %p3826_p11 }
 0x599   : > { %p3829_p0 = pnand %p3828_p13, %p3822_p8 }
 0x59b   : > { %3832 = shalt.err (!%p3829_p0)
}
 0x59c   : > { %3739 = dma.vmem_to_hbm [thread:$0]  (%p3962_p5), %s4790_s17, 64, %s4788_s20, %s3389_s21  }
 0x59d PF: > { %p3745_p1 = scmp.ge.s32.totalorder %s3867_s30, 2  ;;  %s3415_s19 = sand.u32 1, %s3855_s27  }
 0x59e   : > { %s3416_s22 = scalar_lea.sflag [#allocation3], %s3415_s19 }
 0x59f   : > { %p3742_p2 = pnand %p3745_p1, %p3966_p6 }
 0x5a1   : > { %3850 = dma.done.wait (!%p3742_p2), %s3416_s22, 64  }
 0x5a2   : > { %3852 = vsyncadd (!%p3742_p2), %s3416_s22, 4294967232  ;;  %p18_p3 = scmp.ge.s32.totalorder %s3949_s11, 4   ;;  %s4847_s27 = smov %s3859_s28 }
 0x5a3   : > { %s4848_s28 = smov %s3863_s29  ;;  %s4849_s29 = smov %s3960_s14 }
 0x5a4   : > { %s4850_s30 = smov %s3949_s11  ;;  %20 = sbr.rel (!%p18_p3) target bundleno = 3 (0x3), region = 87 }
 0x5ab   :  { %3421 = vsyncpa [#allocation3], 1 }
 0x5ac   :  { %3423 = vsyncpa [#allocation3 + $0x1], 1 }

</bundles_post_ra>
